<compile_context>
chip_gen: v7x
topology: tpu7x:2x2x1
jax: 0.10.0
libtpu: 0.0.40
codegen_flags: <defaults>
</compile_context>

<pallas_src>
import functools

import jax
import jax.numpy as jnp
from jax.experimental import pallas as pl
from jax.experimental.pallas import tpu as pltpu

VMEM_LIMIT = 32 * 1024 * 1024  # explicit, safe on v5e / v6e / v7x


# ----------------------------------------------------------------------------
# Conv kernels (3x3 "same" conv as 9 accumulated tap-matmuls)
# ----------------------------------------------------------------------------
def _conv_taps(x, w_ref, h, w, c_in):
    """x: (h+2, w+2, c_in) bf16 halo'd tile; w_ref: (9*c_in, c_out) bf16."""
    c_out = w_ref.shape[-1]
    acc = jnp.zeros((h * w, c_out), jnp.float32)
    for tap in range(9):
        di, dj = divmod(tap, 3)
        patch = x[di:di + h, dj:dj + w, :].reshape(h * w, c_in)
        w_tap = w_ref[tap * c_in:(tap + 1) * c_in, :]
        acc = acc + jnp.dot(patch, w_tap, preferred_element_type=jnp.float32)
    return acc


def _conv3x3_kernel(x_ref, w_ref, b_ref, o_ref, *, relu):
    h, w = o_ref.shape[1], o_ref.shape[2]
    c_in = x_ref.shape[-1]
    c_out = o_ref.shape[-1]
    acc = _conv_taps(x_ref[0], w_ref, h, w, c_in) + b_ref[...]
    if relu:
        acc = jnp.maximum(acc, 0.0)
    o_ref[0] = acc.reshape(h, w, c_out).astype(o_ref.dtype)


def conv3x3(x_pad, wm, b, *, relu, out_dtype=jnp.bfloat16):
    n, hp, wp, c_in = x_pad.shape
    h, w = hp - 2, wp - 2
    c_out = wm.shape[-1]
    return pl.pallas_call(
        functools.partial(_conv3x3_kernel, relu=relu),
        out_shape=jax.ShapeDtypeStruct((n, h, w, c_out), out_dtype),
        grid=(n,),
        in_specs=[
            pl.BlockSpec((1, hp, wp, c_in), lambda i: (i, 0, 0, 0)),
            pl.BlockSpec((9 * c_in, c_out), lambda i: (0, 0)),
            pl.BlockSpec((1, c_out), lambda i: (0, 0)),
        ],
        out_specs=pl.BlockSpec((1, h, w, c_out), lambda i: (i, 0, 0, 0)),
        compiler_params=pltpu.CompilerParams(
            dimension_semantics=("parallel",),
            vmem_limit_bytes=VMEM_LIMIT),
    )(x_pad, wm, b)


def _conv_res_gap_proj_kernel(x_ref, w_ref, b_ref, res_ref, pw_ref, pb_ref,
                              o_ref):
    h, w = res_ref.shape[1], res_ref.shape[2]
    c_in = x_ref.shape[-1]
    c_out = res_ref.shape[-1]
    acc = _conv_taps(x_ref[0], w_ref, h, w, c_in) + b_ref[...]
    # fused residual add + relu (replaces the former standalone add_relu pass)
    res = res_ref[0].reshape(h * w, c_out).astype(jnp.float32)
    act = jnp.maximum(acc + res, 0.0)
    # fused global-average-pool + projection (+relu) epilogue
    pooled = jnp.mean(act, axis=0, keepdims=True)                 # (1, c_out)
    feat = jnp.dot(pooled.astype(jnp.bfloat16), pw_ref[...],
                   preferred_element_type=jnp.float32) + pb_ref[...]
    o_ref[0] = jnp.maximum(feat, 0.0)


def conv3x3_res_gap_proj(x_pad, wm, b, res, pw, pb):
    n, hp, wp, c_in = x_pad.shape
    h, w = hp - 2, wp - 2
    c_out = wm.shape[-1]
    d = pw.shape[-1]
    return pl.pallas_call(
        _conv_res_gap_proj_kernel,
        out_shape=jax.ShapeDtypeStruct((n, 1, d), jnp.float32),
        grid=(n,),
        in_specs=[
            pl.BlockSpec((1, hp, wp, c_in), lambda i: (i, 0, 0, 0)),
            pl.BlockSpec((9 * c_in, c_out), lambda i: (0, 0)),
            pl.BlockSpec((1, c_out), lambda i: (0, 0)),
            pl.BlockSpec((1, h, w, c_out), lambda i: (i, 0, 0, 0)),
            pl.BlockSpec((c_out, d), lambda i: (0, 0)),
            pl.BlockSpec((1, d), lambda i: (0, 0)),
        ],
        out_specs=pl.BlockSpec((1, 1, d), lambda i: (i, 0, 0)),
        compiler_params=pltpu.CompilerParams(
            dimension_semantics=("parallel",),
            vmem_limit_bytes=VMEM_LIMIT),
    )(x_pad, wm, b, res, pw, pb)


# ----------------------------------------------------------------------------
# Head kernel: fc1 -> bn1 -> relu -> fc2 -> bn2 -> relu -> dropout -> fc3,
# all T time-steps batched into one call (M = B*T), per-t BatchNorm stats.
# ----------------------------------------------------------------------------
def _head_kernel(x_ref, w1_ref, b1_ref, g1_ref, be1_ref,
                 w2_ref, b2_ref, g2_ref, be2_ref,
                 mask_ref, w3_ref, b3_ref, o_ref, *, eps):
    b, t, d = x_ref.shape

    def fc(h2d, w_ref_, bias_ref):
        return (jnp.dot(h2d.astype(jnp.bfloat16), w_ref_[...],
                        preferred_element_type=jnp.float32) + bias_ref[...])

    def bn_relu(h2d, gamma, beta):
        # torch BatchNorm1d training-mode forward: biased batch statistics over
        # the B samples of each time-step, fused into one scale/shift.
        f = h2d.shape[-1]
        h3 = h2d.reshape(b, t, f)
        mu = jnp.mean(h3, axis=0, keepdims=True)
        var = jnp.mean((h3 - mu) ** 2, axis=0, keepdims=True)
        scale = gamma * jax.lax.rsqrt(var + eps)
        shift = beta - mu * scale
        return jnp.maximum(h3 * scale + shift, 0.0).reshape(b * t, f)

    x = x_ref[...].reshape(b * t, d)
    h = bn_relu(fc(x, w1_ref, b1_ref), g1_ref[...], be1_ref[...])
    h = bn_relu(fc(h, w2_ref, b2_ref), g2_ref[...], be2_ref[...])
    h = h * mask_ref[...].reshape(b * t, -1)        # dropout (host-made mask)
    out = fc(h, w3_ref, b3_ref)
    o_ref[...] = out.reshape(b, t, -1)


def head_forward(feats_btd, p, mask):
    b, t, d = feats_btd.shape
    f1 = p["w1"].shape[-1]
    f2 = p["w2"].shape[-1]
    co = p["w3"].shape[-1]

    def full(shape):
        return pl.BlockSpec(shape, lambda i, _s=shape: (0,) * len(_s))

    return pl.pallas_call(
        functools.partial(_head_kernel, eps=1e-5),
        out_shape=jax.ShapeDtypeStruct((b, t, co), jnp.float32),
        grid=(1,),
        in_specs=[
            full((b, t, d)),
            full((d, f1)), full((1, f1)), full((1, f1)), full((1, f1)),
            full((f1, f2)), full((1, f2)), full((1, f2)), full((1, f2)),
            full((b, t, f2)),
            full((f2, co)), full((1, co)),
        ],
        out_specs=full((b, t, co)),
        compiler_params=pltpu.CompilerParams(
            dimension_semantics=("arbitrary",),
            vmem_limit_bytes=VMEM_LIMIT),
    )(feats_btd, p["w1"], p["b1"], p["g1"], p["beta1"],
      p["w2"], p["b2"], p["g2"], p["beta2"],
      mask, p["w3"], p["b3"])


# ----------------------------------------------------------------------------
# Parameters and end-to-end forward
# ----------------------------------------------------------------------------
def init_params(key, c_in, c1, feat_dim, fc1_, fc2_, cnn_out, c_in_pad=8):
    ks = jax.random.split(key, 10)

    def rnd(k, shape, scale=0.05):
        return scale * jax.random.normal(k, shape, jnp.float32)

    # Conv weights stored in (tap*Cin, Cout) matmul layout, bf16 MXU operands.
    stem = rnd(ks[0], (3, 3, c_in, c1))
    stem = jnp.pad(stem, ((0, 0), (0, 0), (0, c_in_pad - c_in), (0, 0)))
    stem = stem.reshape(9 * c_in_pad, c1).astype(jnp.bfloat16)

    def conv_w(k):
        return rnd(k, (3, 3, c1, c1)).reshape(9 * c1, c1).astype(jnp.bfloat16)

    return {
        # frozen backbone (stand-in for pretrained resnet18)
        "stem_w": stem,
        "stem_b": jnp.zeros((1, c1), jnp.float32),
        "blk_w1": conv_w(ks[1]),
        "blk_b1": jnp.zeros((1, c1), jnp.float32),
        "blk_w2": conv_w(ks[2]),
        "blk_b2": jnp.zeros((1, c1), jnp.float32),
        "proj_w": rnd(ks[3], (c1, feat_dim)).astype(jnp.bfloat16),
        "proj_b": jnp.zeros((1, feat_dim), jnp.float32),
        # trainable head: fc1 / bn1 / fc2 / bn2 / fc3
        "w1": rnd(ks[4], (feat_dim, fc1_)).astype(jnp.bfloat16),
        "b1": rnd(ks[5], (1, fc1_)),
        "g1": jnp.ones((1, fc1_), jnp.float32),
        "beta1": jnp.zeros((1, fc1_), jnp.float32),
        "w2": rnd(ks[6], (fc1_, fc2_)).astype(jnp.bfloat16),
        "b2": rnd(ks[7], (1, fc2_)),
        "g2": jnp.ones((1, fc2_), jnp.float32),
        "beta2": jnp.zeros((1, fc2_), jnp.float32),
        "w3": rnd(ks[8], (fc2_, cnn_out)).astype(jnp.bfloat16),
        "b3": rnd(ks[9], (1, cnn_out)),
    }


def resnet_encoder_forward(x_3d, params, *, dropout, training=True, rng=None):
    b, t, c, h, w = x_3d.shape
    n = b * t
    c_pad = params["stem_w"].shape[0] // 9

    # All frames at once: NCHW -> NHWC (channels on the lane axis), channel-pad
    # to the stem's padded Cin, add the 1-pixel spatial halo, cast to bf16.
    frames = x_3d.reshape(n, c, h, w).transpose(0, 2, 3, 1)
    frames = jnp.pad(frames, ((0, 0), (1, 1), (1, 1), (0, c_pad - c)))
    frames = frames.astype(jnp.bfloat16)

    s = conv3x3(frames, params["stem_w"], params["stem_b"], relu=True)     # (N,H,W,C1)
    sp = jnp.pad(s, ((0, 0), (1, 1), (1, 1), (0, 0)))
    y = conv3x3(sp, params["blk_w1"], params["blk_b1"], relu=True)         # (N,H,W,C1)
    yp = jnp.pad(y, ((0, 0), (1, 1), (1, 1), (0, 0)))
    # conv2 + residual add/relu + global-average-pool + projection, fused.
    feats = conv3x3_res_gap_proj(yp, params["blk_w2"], params["blk_b2"], s,
                                 params["proj_w"], params["proj_b"])       # (N,1,FEAT)
    feats = feats.reshape(b, t, -1)   # frame index n == b*T + t: pure reshape

    f2 = params["w2"].shape[-1]
    if training and dropout > 0.0:
        if rng is None:
            rng = jax.random.PRNGKey(0)
        keep = jax.random.bernoulli(rng, 1.0 - dropout, (b, t, f2))
        mask = keep.astype(jnp.float32) / (1.0 - dropout)
    else:
        mask = jnp.ones((b, t, f2), jnp.float32)

    # Head writes (B, T, CNN_out) directly, matching
    # torch.stack(dim=0).transpose_(0, 1) with no surrounding XLA transposes.
    return head_forward(feats, params, mask)


if __name__ == "__main__":
    B, T, C, H, W = 2, 4, 3, 16, 16
    C1 = 128                      # stand-in backbone width (lane-aligned)
    FEAT = 512                    # resnet18 fc.in_features
    FC1, FC2, CNN_OUT = 256, 128, 128
    DROPOUT = 0.3

    key = jax.random.PRNGKey(0)
    kx, kp, kd = jax.random.split(key, 3)
    x_3d = jax.random.normal(kx, (B, T, C, H, W), jnp.float32)
    params = init_params(kp, C, C1, FEAT, FC1, FC2, CNN_OUT)

    out = resnet_encoder_forward(x_3d, params, dropout=DROPOUT,
                                 training=True, rng=kd)
    out = jax.block_until_ready(out)
    assert out.shape == (B, T, CNN_OUT), out.shape
    assert out.dtype == jnp.float32
    assert bool(jnp.all(jnp.isfinite(out)))
    print("KERNEL_OK")
</pallas_src>

<mosaic_0001>
module attributes {stable_mosaic.version = 11 : i64} {
  func.func @_conv3x3_kernel(%arg0: i32, %arg1: memref<1x18x18x8xbf16, #tpu.memory_space<vmem>>, %arg2: memref<72x128xbf16, #tpu.memory_space<vmem>>, %arg3: memref<1x128xf32, #tpu.memory_space<vmem>>, %arg4: memref<1x16x16x128xbf16, #tpu.memory_space<vmem>>) attributes {dimension_semantics = [#tpu.dimension_semantics<parallel>], iteration_bounds = array<i64: 8>, scalar_prefetch = 0 : i64, scratch_operands = 0 : i64, tpu.core_type = #tpu.core_type<tc>, window_params = [{transform_indices = @transform_0, window_bounds = array<i64: 1, 18, 18, 8>}, {pipeline_mode = #tpu.pipeline_mode<synchronous>, transform_indices = @transform_1, window_bounds = array<i64: 72, 128>}, {pipeline_mode = #tpu.pipeline_mode<synchronous>, transform_indices = @transform_2, window_bounds = array<i64: 1, 128>}, {transform_indices = @transform_3, window_bounds = array<i64: 1, 16, 16, 128>}]} {
    %c0 = arith.constant 0 : index
    %c0_0 = arith.constant 0 : index
    %c0_1 = arith.constant 0 : index
    %c0_2 = arith.constant 0 : index
    %0 = vector.load %arg1[%c0, %c0_0, %c0_1, %c0_2] : memref<1x18x18x8xbf16, #tpu.memory_space<vmem>>, vector<1x18x18x8xbf16>
    %1 = vector.shape_cast %0 : vector<1x18x18x8xbf16> to vector<18x18x8xbf16>
    %cst = arith.constant 0.000000e+00 : f32
    %2 = vector.broadcast %cst : f32 to vector<256x128xf32>
    %3 = vector.extract_strided_slice %1 {offsets = [0, 0, 0], sizes = [16, 16, 8], strides = [1, 1, 1]} : vector<18x18x8xbf16> to vector<16x16x8xbf16>
    %4 = vector.shape_cast %3 : vector<16x16x8xbf16> to vector<256x8xbf16>
    %c0_3 = arith.constant 0 : index
    %c0_4 = arith.constant 0 : index
    %5 = vector.load %arg2[%c0_3, %c0_4] : memref<72x128xbf16, #tpu.memory_space<vmem>>, vector<8x128xbf16>
    %cst_5 = arith.constant dense<0.000000e+00> : vector<256x128xf32>
    %6 = tpu.matmul %4, %5, %cst_5 {dimension_numbers = #tpu.dot_dimension_numbers<[1], [0], [0], [1], [0, 0, 1, 1], [], []>} : vector<256x8xbf16>, vector<8x128xbf16>, vector<256x128xf32> -> vector<256x128xf32>
    %7 = arith.addf %2, %6 : vector<256x128xf32>
    %8 = vector.extract_strided_slice %1 {offsets = [0, 1, 0], sizes = [16, 16, 8], strides = [1, 1, 1]} : vector<18x18x8xbf16> to vector<16x16x8xbf16>
    %9 = vector.shape_cast %8 : vector<16x16x8xbf16> to vector<256x8xbf16>
    %c8 = arith.constant 8 : index
    %c0_6 = arith.constant 0 : index
    %10 = vector.load %arg2[%c8, %c0_6] : memref<72x128xbf16, #tpu.memory_space<vmem>>, vector<8x128xbf16>
    %cst_7 = arith.constant dense<0.000000e+00> : vector<256x128xf32>
    %11 = tpu.matmul %9, %10, %cst_7 {dimension_numbers = #tpu.dot_dimension_numbers<[1], [0], [0], [1], [0, 0, 1, 1], [], []>} : vector<256x8xbf16>, vector<8x128xbf16>, vector<256x128xf32> -> vector<256x128xf32>
    %12 = arith.addf %7, %11 : vector<256x128xf32>
    %13 = vector.extract_strided_slice %1 {offsets = [0, 2, 0], sizes = [16, 16, 8], strides = [1, 1, 1]} : vector<18x18x8xbf16> to vector<16x16x8xbf16>
    %14 = vector.shape_cast %13 : vector<16x16x8xbf16> to vector<256x8xbf16>
    %c16 = arith.constant 16 : index
    %c0_8 = arith.constant 0 : index
    %15 = vector.load %arg2[%c16, %c0_8] : memref<72x128xbf16, #tpu.memory_space<vmem>>, vector<8x128xbf16>
    %cst_9 = arith.constant dense<0.000000e+00> : vector<256x128xf32>
    %16 = tpu.matmul %14, %15, %cst_9 {dimension_numbers = #tpu.dot_dimension_numbers<[1], [0], [0], [1], [0, 0, 1, 1], [], []>} : vector<256x8xbf16>, vector<8x128xbf16>, vector<256x128xf32> -> vector<256x128xf32>
    %17 = arith.addf %12, %16 : vector<256x128xf32>
    %18 = vector.extract_strided_slice %1 {offsets = [1, 0, 0], sizes = [16, 16, 8], strides = [1, 1, 1]} : vector<18x18x8xbf16> to vector<16x16x8xbf16>
    %19 = vector.shape_cast %18 : vector<16x16x8xbf16> to vector<256x8xbf16>
    %c24 = arith.constant 24 : index
    %c0_10 = arith.constant 0 : index
    %20 = vector.load %arg2[%c24, %c0_10] : memref<72x128xbf16, #tpu.memory_space<vmem>>, vector<8x128xbf16>
    %cst_11 = arith.constant dense<0.000000e+00> : vector<256x128xf32>
    %21 = tpu.matmul %19, %20, %cst_11 {dimension_numbers = #tpu.dot_dimension_numbers<[1], [0], [0], [1], [0, 0, 1, 1], [], []>} : vector<256x8xbf16>, vector<8x128xbf16>, vector<256x128xf32> -> vector<256x128xf32>
    %22 = arith.addf %17, %21 : vector<256x128xf32>
    %23 = vector.extract_strided_slice %1 {offsets = [1, 1, 0], sizes = [16, 16, 8], strides = [1, 1, 1]} : vector<18x18x8xbf16> to vector<16x16x8xbf16>
    %24 = vector.shape_cast %23 : vector<16x16x8xbf16> to vector<256x8xbf16>
    %c32 = arith.constant 32 : index
    %c0_12 = arith.constant 0 : index
    %25 = vector.load %arg2[%c32, %c0_12] : memref<72x128xbf16, #tpu.memory_space<vmem>>, vector<8x128xbf16>
    %cst_13 = arith.constant dense<0.000000e+00> : vector<256x128xf32>
    %26 = tpu.matmul %24, %25, %cst_13 {dimension_numbers = #tpu.dot_dimension_numbers<[1], [0], [0], [1], [0, 0, 1, 1], [], []>} : vector<256x8xbf16>, vector<8x128xbf16>, vector<256x128xf32> -> vector<256x128xf32>
    %27 = arith.addf %22, %26 : vector<256x128xf32>
    %28 = vector.extract_strided_slice %1 {offsets = [1, 2, 0], sizes = [16, 16, 8], strides = [1, 1, 1]} : vector<18x18x8xbf16> to vector<16x16x8xbf16>
    %29 = vector.shape_cast %28 : vector<16x16x8xbf16> to vector<256x8xbf16>
    %c40 = arith.constant 40 : index
    %c0_14 = arith.constant 0 : index
    %30 = vector.load %arg2[%c40, %c0_14] : memref<72x128xbf16, #tpu.memory_space<vmem>>, vector<8x128xbf16>
    %cst_15 = arith.constant dense<0.000000e+00> : vector<256x128xf32>
    %31 = tpu.matmul %29, %30, %cst_15 {dimension_numbers = #tpu.dot_dimension_numbers<[1], [0], [0], [1], [0, 0, 1, 1], [], []>} : vector<256x8xbf16>, vector<8x128xbf16>, vector<256x128xf32> -> vector<256x128xf32>
    %32 = arith.addf %27, %31 : vector<256x128xf32>
    %33 = vector.extract_strided_slice %1 {offsets = [2, 0, 0], sizes = [16, 16, 8], strides = [1, 1, 1]} : vector<18x18x8xbf16> to vector<16x16x8xbf16>
    %34 = vector.shape_cast %33 : vector<16x16x8xbf16> to vector<256x8xbf16>
    %c48 = arith.constant 48 : index
    %c0_16 = arith.constant 0 : index
    %35 = vector.load %arg2[%c48, %c0_16] : memref<72x128xbf16, #tpu.memory_space<vmem>>, vector<8x128xbf16>
    %cst_17 = arith.constant dense<0.000000e+00> : vector<256x128xf32>
    %36 = tpu.matmul %34, %35, %cst_17 {dimension_numbers = #tpu.dot_dimension_numbers<[1], [0], [0], [1], [0, 0, 1, 1], [], []>} : vector<256x8xbf16>, vector<8x128xbf16>, vector<256x128xf32> -> vector<256x128xf32>
    %37 = arith.addf %32, %36 : vector<256x128xf32>
    %38 = vector.extract_strided_slice %1 {offsets = [2, 1, 0], sizes = [16, 16, 8], strides = [1, 1, 1]} : vector<18x18x8xbf16> to vector<16x16x8xbf16>
    %39 = vector.shape_cast %38 : vector<16x16x8xbf16> to vector<256x8xbf16>
    %c56 = arith.constant 56 : index
    %c0_18 = arith.constant 0 : index
    %40 = vector.load %arg2[%c56, %c0_18] : memref<72x128xbf16, #tpu.memory_space<vmem>>, vector<8x128xbf16>
    %cst_19 = arith.constant dense<0.000000e+00> : vector<256x128xf32>
    %41 = tpu.matmul %39, %40, %cst_19 {dimension_numbers = #tpu.dot_dimension_numbers<[1], [0], [0], [1], [0, 0, 1, 1], [], []>} : vector<256x8xbf16>, vector<8x128xbf16>, vector<256x128xf32> -> vector<256x128xf32>
    %42 = arith.addf %37, %41 : vector<256x128xf32>
    %43 = vector.extract_strided_slice %1 {offsets = [2, 2, 0], sizes = [16, 16, 8], strides = [1, 1, 1]} : vector<18x18x8xbf16> to vector<16x16x8xbf16>
    %44 = vector.shape_cast %43 : vector<16x16x8xbf16> to vector<256x8xbf16>
    %c64 = arith.constant 64 : index
    %c0_20 = arith.constant 0 : index
    %45 = vector.load %arg2[%c64, %c0_20] : memref<72x128xbf16, #tpu.memory_space<vmem>>, vector<8x128xbf16>
    %cst_21 = arith.constant dense<0.000000e+00> : vector<256x128xf32>
    %46 = tpu.matmul %44, %45, %cst_21 {dimension_numbers = #tpu.dot_dimension_numbers<[1], [0], [0], [1], [0, 0, 1, 1], [], []>} : vector<256x8xbf16>, vector<8x128xbf16>, vector<256x128xf32> -> vector<256x128xf32>
    %47 = arith.addf %42, %46 : vector<256x128xf32>
    %c0_22 = arith.constant 0 : index
    %c0_23 = arith.constant 0 : index
    %48 = vector.load %arg3[%c0_22, %c0_23] : memref<1x128xf32, #tpu.memory_space<vmem>>, vector<1x128xf32>
    %49 = vector.broadcast %48 : vector<1x128xf32> to vector<256x128xf32>
    %50 = arith.addf %47, %49 : vector<256x128xf32>
    %cst_24 = arith.constant 0.000000e+00 : f32
    %51 = vector.broadcast %cst_24 : f32 to vector<256x128xf32>
    %52 = arith.maximumf %50, %51 : vector<256x128xf32>
    %53 = vector.shape_cast %52 : vector<256x128xf32> to vector<16x16x128xf32>
    %54 = arith.truncf %53 : vector<16x16x128xf32> to vector<16x16x128xbf16>
    %c0_25 = arith.constant 0 : index
    %c0_26 = arith.constant 0 : index
    %c0_27 = arith.constant 0 : index
    %c0_28 = arith.constant 0 : index
    %55 = vector.load %arg4[%c0_25, %c0_26, %c0_27, %c0_28] : memref<1x16x16x128xbf16, #tpu.memory_space<vmem>>, vector<1x16x16x128xbf16>
    %56 = vector.shape_cast %55 : vector<1x16x16x128xbf16> to vector<16x16x128xbf16>
    %57 = vector.shape_cast %54 : vector<16x16x128xbf16> to vector<1x16x16x128xbf16>
    tpu.vector_store %arg4[%c0_25, %c0_26, %c0_27, %c0_28], %57 {strides = array<i32>} : memref<1x16x16x128xbf16, #tpu.memory_space<vmem>>, vector<1x16x16x128xbf16>,
    return
  }
  func.func @transform_0(%arg0: i32) -> (i32, i32, i32, i32) {
    %c0_i32 = arith.constant 0 : i32
    %c0_i32_0 = arith.constant 0 : i32
    %c0_i32_1 = arith.constant 0 : i32
    %c0_i32_2 = arith.constant 0 : i32
    return %arg0, %c0_i32, %c0_i32_0, %c0_i32_1 : i32, i32, i32, i32
  }
  func.func @transform_1(%arg0: i32) -> (i32, i32) {
    %c0_i32 = arith.constant 0 : i32
    %c0_i32_0 = arith.constant 0 : i32
    %c0_i32_1 = arith.constant 0 : i32
    return %c0_i32, %c0_i32_0 : i32, i32
  }
  func.func @transform_2(%arg0: i32) -> (i32, i32) {
    %c0_i32 = arith.constant 0 : i32
    %c0_i32_0 = arith.constant 0 : i32
    %c0_i32_1 = arith.constant 0 : i32
    return %c0_i32, %c0_i32_0 : i32, i32
  }
  func.func @transform_3(%arg0: i32) -> (i32, i32, i32, i32) {
    %c0_i32 = arith.constant 0 : i32
    %c0_i32_0 = arith.constant 0 : i32
    %c0_i32_1 = arith.constant 0 : i32
    %c0_i32_2 = arith.constant 0 : i32
    return %arg0, %c0_i32, %c0_i32_0, %c0_i32_1 : i32, i32, i32, i32
  }
}

</mosaic_0001>

<bundles_post_ra>
// kernel: tpu_custom_call.1
= control target key start
LH: loop header
LB: loop body
LE: loop exit
PB: predicated region body
PF: predicated region fallthrough
CT: control target
= control target key end

     0   :  { %8 = vsyncpa [#allocation3], 0  ;;  %s5574_s0 = inlined_call_operand.vmem [shape: bf16[8,18,18,8], index: 0, kind: input, shape index: {}]   ;;  %s5575_s1 = inlined_call_operand.vmem [shape: bf16[72,128], index: 1, kind: input, shape index: {}]   ;;  %s5576_s2 = inlined_call_operand.vmem [shape: f32[1,128], index: 2, kind: input, shape index: {}]   ;;  %s5577_s3 = inlined_call_operand.hbm [shape: bf16[8,16,16,128], index: 3, kind: output, shape index: {}]  }
   0x1   :  { %10 = vsyncpa [#allocation3 + $0x1], 0  ;;  %s4450_s12 = smov 0   ;;  %s4452_s13 = smov 0  }
   0x2   :  { %s4454_s14 = smov 0   ;;  %s4456_s15 = smov 0  }
   0x3 LB: > { %s4471_s16 = sadd.s32 4294967295, %s4425_s15   ;;  %s3184_s17 = sadd.s32 4294967294, %s4425_s15   ;;  %s4425_s15 = sphi %s4456_s15, %s5660_s15   ;;  %s4421_s14 = sphi %s4454_s14, %s5659_s14   ;;  %s4417_s13 = sphi %s4452_s13, %s5658_s13   ;;  %s4413_s12 = sphi %s4450_s12, %s5657_s12  }
   0x4   : > { %s4475_s18 = sadd.s32 1, %s4425_s15   ;;  %s91_s19 = sadd.s32 1, %s4421_s14 }
   0x5   : > { %s88_s20 = ssub.s32 %s4425_s15, %s4475_s18  ;;  %p101_p0 = scmp.ne.s32.totalorder %s4421_s14, %s4417_s13 }
   0x6   : > { %p89_p1 = scmp.eq.s32.totalorder %s88_s20, 0  ;;  %p102_p2 = scmp.eq.s32.totalorder %s4471_s16, 7 }
   0x7   : > { %p107_p3 = scmp.ne.s32.totalorder %s4417_s13, %s4413_s12  ;;  %p108_p4 = scmp.eq.s32.totalorder %s3184_s17, 7 }
   0x8   : > { %s4486_s21 = scalar_select %p89_p1, %s4421_s14, %s91_s19  }
   0x9   : > { %p4488_p5 = por %p102_p2, %p101_p0  ;;  %p4492_p6 = por %p108_p4, %p107_p3 }
   0xa   : > { %p3187_p7 = scmp.ge.s32.totalorder %s4425_s15, 1  ;;  %p140_p8 = scmp.lt.s32.totalorder %s4425_s15, 9 }
   0xc   : > { %p141_p9 = pnand %p3187_p7, %p140_p8 }
   0xe   : > { %144 = sbr.rel (%p141_p9) target bundleno = 578 (0x242), region = 32 }
  0x15   : > { %v612_v0 = vld [vmem:[%s5575_s1 + $0x4] sm:$0xf]  ;;  %vm710_vm0 = vcmask 1043456   ;;  %v1820_v1 = vld [vmem:[%s5575_s1 + $0x10] sm:$0xf]  ;;  %p164_p10 = scmp.lt.s32.totalorder %s4471_s16, 7 }
  0x16   : > { %4289 = vmatprep.subr.msk.bf16.mxu1 %vm710_vm0, %v612_v0  ;;  %4293 = vmatprep.subr.msk.bf16.mxu0 %vm710_vm0, %v1820_v1  ;;  %v712_v2 = vsel %vm710_vm0, %v612_v0, 0  ;;  %v4509_v3 = vsel %vm710_vm0, %v1820_v1, 0  ;;  %v224_v4 = vld [vmem:[%s5575_s1] sm:$0xf]  ;;  %v2031_v5 = vld [vmem:[%s5575_s1 + $0x14] sm:$0xf] }
  0x17   : > { %5611 = vst [vmem:[#allocation5_spill] sm:$0xff] %v4509_v3  ;;  %3726 = vmatpush3.bf16.msra.mxu1 %v712_v2  ;;  %3862 = vmatpush3.bf16.msra.mxu0 %v4509_v3  ;;  %s165_s28 = scalar_select %p164_p10, %s4471_s16, 7  ;;  %vm225_vm1 = vsmask.f32 3328  ;;  %vm226_vm2 = vsmask.f32 7440 }
  0x18   : > { %4290 = vmatprep.subr.msk.bf16.mxu1 %vm710_vm0, %v224_v4  ;;  %4295 = vmatprep.subr.msk.bf16.mxu0 %vm710_vm0, %v2031_v5  ;;  %v4527_v6 = vsel %vm710_vm0, %v224_v4, 0  ;;  %v4530_v7 = vsel %vm710_vm0, %v2031_v5, 0  ;;  %v4535_v8 = vld [vmem:[%s5575_s1 + $0x18] sm:$0xf]  ;;  %vm661_vm3 = vcmask 64512   ;;  %vm4571_vm4 = vmor %vm225_vm1, %vm226_vm2  ;;  %vm1183_vm5 = vcmask 1042432  }
  0x19   : > { %s4299_s6 = smul.u32 216, %s165_s28  ;;  %v4559_v20 = vsel %vm710_vm0, %v4535_v8, 0  ;;  %vm1184_vm6 = vcmask 1046532   ;;  %s4427_s24 = smov [#allocation2]  }
  0x1a   : > { %vm4752_vm7 = vmor %vm1183_vm5, %vm1184_vm6  ;;  %s4367_s25 = sshll.u32 %s4427_s24, 4  ;;  %s4368_s25 = int_to_ptr.vmem [resolvable:$false] %s4367_s25 }
  0x1b   : > { %s4524_s9 = scalar_lea.vmem %s5574_s0, %s4299_s6  ;;  %s161_s6 = sand.u32 1, %s4417_s13  }
  0x1c   : > { %v4538_v9 = vld [vmem:[%s4524_s9] sm:$0xf]  ;;  %v4541_v10 = vld [vmem:[%s4524_s9 + $0x4] sm:$0xf]  ;;  %v172_v11 = vld [vmem:[%s4524_s9 + $0x8] sm:$0x1] }
  0x1d   : > { %v229_v12 = vshrl.u32 %v4538_v9, 16  ;;  %v232_v13 = vshll.u32 %v4538_v9, 16  ;;  %v238_v14 = vshll.u32 %v4541_v10, 16  ;;  %v242_v15 = vshrl.u32 %v4541_v10, 16  ;;  %v4549_v16 = vld [vmem:[%s4524_s9 + $0xc] sm:$0xf] }
  0x1e   : > { %v248_v17 = vshll.u32 %v172_v11, 16  ;;  %v4552_v18 = vld [vmem:[%s4524_s9 + $0x10] sm:$0xf]  ;;  %v4555_v19 = vld [vmem:[%s4524_s9 + $0x14] sm:$0x1]  ;;  %v253_v26 = vshrl.u32 %v4549_v16, 16 }
  0x1f   : > { %v231_v21 = vrot.slane %v229_v12, 4  ;;  %v234_v22 = vrot.slane %v232_v13, 5  ;;  %v240_v23 = vrot.slane %v238_v14, 5  ;;  %v244_v24 = vrot.slane %v242_v15, 4  ;;  %v4567_v33 = vld [vmem:[%s4524_s9 + $0x18] sm:$0xf] }
  0x20   : > { %v250_v25 = vrot.slane %v248_v17, 5  ;;  %v256_v27 = vshll.u32 %v4549_v16, 16  ;;  %v262_v28 = vshll.u32 %v4552_v18, 16  ;;  %v266_v31 = vshrl.u32 %v4552_v18, 16  ;;  %v4580_v39 = vld [vmem:[%s4524_s9 + $0x1c] sm:$0xf] }
  0x21   : > { %v235_v29 = vor.u32 %v234_v22, %v231_v21  ;;  %v245_v30 = vor.u32 %v244_v24, %v240_v23  ;;  %v272_v32 = vshll.u32 %v4555_v19, 16  ;;  %v255_v35 = vrot.slane %v253_v26, 4  ;;  %v4584_v46 = vld [vmem:[%s4524_s9 + $0x20] sm:$0x1]  ;;  %v4594_v57 = vld [vmem:[%s4524_s9 + $0x24] sm:$0xf] }
  0x22   : > { %v258_v36 = vrot.slane %v256_v27, 5  ;;  %v264_v37 = vrot.slane %v262_v28, 5  ;;  %v4577_v38 = vcombine.low %v4549_v16, %v4552_v18  ;;  %v268_v42 = vrot.slane %v266_v31, 4  ;;  %v4599_v62 = vld [vmem:[%s4524_s9 + $0x28] sm:$0xf]  ;;  %s3188_s7 = sshll.u32 %s161_s6, 7 }
  0x23   : > { %v236_v40 = vrot.slane %v235_v29, 4  ;;  %v246_v41 = vrot.slane %v245_v30, 4  ;;  %v274_v43 = vrot.slane %v272_v32, 5  ;;  %v1198_v45 = vrot.slane %v4555_v19, 5  ;;  %v4607_v4 = vld [vmem:[%s4524_s9 + $0x2c] sm:$0x1] }
  0x24   : > { %v259_v44 = vor.u32 %v258_v36, %v255_v35  ;;  %v277_v47 = vshrl.u32 %v4567_v33, 16  ;;  %v280_v48 = vshll.u32 %v4567_v33, 16  ;;  %v269_v51 = vor.u32 %v268_v42, %v264_v37  ;;  %v4613_v14 = vld [vmem:[%s4524_s9 + $0x30] sm:$0xf]  ;;  %v4625_v28 = vld [vmem:[%s4524_s9 + $0x34] sm:$0xf] }
  0x25   : > { %v241_v49 = vsel %vm4571_vm4, %v236_v40, %v240_v23  ;;  %v251_v50 = vsel %vm4571_vm4, %v246_v41, %v250_v25  ;;  %v286_v52 = vshll.u32 %v4580_v39, 16  ;;  %v290_v60 = vshrl.u32 %v4580_v39, 16  ;;  %v4620_v23 = vld [vmem:[%s5575_s1 + $0x8] sm:$0xf]  ;;  %v4632_v32 = vld [vmem:[%s4524_s9 + $0x38] sm:$0x1] }
  0x26   : > { %v3190_v53 = vcombine.low %v241_v49, %v251_v50  ;;  %v260_v54 = vrot.slane %v259_v44, 4  ;;  %v279_v55 = vrot.slane %v277_v47, 4  ;;  %v282_v56 = vrot.slane %v280_v48, 5  ;;  %v4640_v48 = vld [vmem:[%s4524_s9 + $0x3c] sm:$0xf]  ;;  %s5472_s8 = scalar_lea.vmem [#allocation2], %s3188_s7 }
  0x27   : > { %v270_v58 = vrot.slane %v269_v51, 4  ;;  %v288_v59 = vrot.slane %v286_v52, 5  ;;  %v296_v61 = vshll.u32 %v4584_v46, 16  ;;  %v1202_v1 = vrot.slane %v4580_v39, 5  ;;  %v4648_v52 = vld [vmem:[%s4524_s9 + $0x40] sm:$0xf] }
  0x28   : > { %3727 = vmatprep.mubr.msk.bf16.mxu1 %vm661_vm3, %v3190_v53  ;;  %v265_v63 = vsel %vm4571_vm4, %v260_v54, %v264_v37  ;;  %v283_v0 = vor.u32 %v282_v56, %v279_v55  ;;  %v1205_v2 = vrot.slane %v4584_v46, 5  ;;  %v292_v11 = vrot.slane %v290_v60, 4  ;;  %s3122_s10 = sshll.u32 %s5472_s8, 4  ;;  %s4369_s26 = scalar_lea.vmem %s4368_s25, 4096  ;;  %s5527_s10 = int_to_ptr.vmem [resolvable:$true] %s3122_s10 }
  0x29   : > { %v275_v5 = vsel %vm4571_vm4, %v270_v58, %v274_v43  ;;  %v298_v12 = vrot.slane %v296_v61, 5  ;;  %v301_v13 = vshrl.u32 %v4594_v57, 16  ;;  %v304_v21 = vshll.u32 %v4594_v57, 16  ;;  %s4363_s20 = scalar_lea.vmem %s5527_s10, 2048  ;;  %p4370_p0 = scmp.lt.s32.totalorder %s5527_s10, %s4368_s25 }
  0x2a   : > { %v3191_v15 = vcombine.low %v265_v63, %v275_v5  ;;  %v284_v17 = vrot.slane %v283_v0, 4  ;;  %v310_v22 = vshll.u32 %v4599_v62, 16  ;;  %v293_v24 = vor.u32 %v292_v11, %v288_v59  ;;  %v4660_v5 = vld [vmem:[%s4524_s9 + $0x44] sm:$0x1]  ;;  %p4364_p11 = scmp.ne.s32.totalorder %s5527_s10, %s4363_s20  ;;  %p4371_p1 = scmp.lt.s32.totalorder %s4369_s26, %s4363_s20 }
  0x2b   : > { %v303_v25 = vrot.slane %v301_v13, 4  ;;  %v314_v26 = vshrl.u32 %v4599_v62, 16  ;;  %v320_v27 = vshll.u32 %v4607_v4, 16  ;;  %v306_v30 = vrot.slane %v304_v21, 5  ;;  %v4665_v13 = vld [vmem:[%s4524_s9 + $0x48] sm:$0xf] }
  0x2c   : > { %3863 = vmatprep.mubr.msk.bf16.mxu0 %vm661_vm3, %v3191_v15  ;;  %3728 = vmatmul.mubr.msk.bf16.vlgmr.msra.gmra.mrb[0].mxu1 %vm661_vm3, %v3191_v15  ;;  %v289_v29 = vsel %vm4571_vm4, %v284_v17, %v288_v59  ;;  %v312_v31 = vrot.slane %v310_v22, 5  ;;  %v325_v35 = vshrl.u32 %v4613_v14, 16  ;;  %v294_v36 = vrot.slane %v293_v24, 4  ;;  %v4672_v24 = vld [vmem:[%s4524_s9 + $0x4c] sm:$0xf]  ;;  %p4365_p12 = pnand %p4364_p11, %p4488_p5  ;;  %p4372_p2 = por %p4371_p1, %p4370_p0 }
  0x2d   : > { %3760 = vmatpush3.bf16.msra.mxu1 %v4527_v6  ;;  %v316_v37 = vrot.slane %v314_v26, 4  ;;  %v322_v40 = vrot.slane %v320_v27, 5  ;;  %v328_v41 = vshll.u32 %v4613_v14, 16  ;;  %v307_v42 = vor.u32 %v306_v30, %v303_v25 }
  0x2e   : > { %v327_v43 = vrot.slane %v325_v35, 4  ;;  %v334_v44 = vshll.u32 %v4625_v28, 16  ;;  %v338_v47 = vshrl.u32 %v4625_v28, 16  ;;  %4291 = vmatprep.subr.msk.bf16.mxu1 %vm710_vm0, %v4620_v23  ;;  %v299_v49 = vsel %vm4571_vm4, %v294_v36, %v298_v12  ;;  %p4366_p13 = pneg %p4365_p12 }
  0x2f   : > { %v317_v6 = vor.u32 %v316_v37, %v312_v31  ;;  %v330_v50 = vrot.slane %v328_v41, 5  ;;  %v344_v51 = vshll.u32 %v4632_v32, 16  ;;  %v4650_v53 = vcombine.low %v289_v29, %v299_v49 }
  0x30   : > { %v308_v54 = vrot.slane %v307_v42, 4  ;;  %v336_v55 = vrot.slane %v334_v44, 5  ;;  %v340_v56 = vrot.slane %v338_v47, 4  ;;  %v349_v61 = vshrl.u32 %v4640_v48, 16  ;;  %v4694_v42 = vld [vmem:[%s4524_s9 + $0x54] sm:$0xf]  ;;  %p4373_p3 = pnand %p4372_p2, %p4366_p13 }
  0x31   : > { %5614 = vst [vmem:[#allocation6_spill] sm:$0xff] %v4650_v53  ;;  %v318_v58 = vrot.slane %v317_v6, 4  ;;  %v331_v59 = vor.u32 %v330_v50, %v327_v43  ;;  %v346_v60 = vrot.slane %v344_v51, 5  ;;  %3864 = vmatmul.mubr.msk.bf16.vlgmr.msra.gmra.mrb[0].mxu0 %vm661_vm3, %v4650_v53  ;;  %3731 = vmatprep.mubr.msk.bf16.mxu1 %vm661_vm3, %v4650_v53  ;;  %v352_v11 = vshll.u32 %v4640_v48, 16  ;;  %5616 = vst [vmem:[#allocation8_spill] sm:$0xff] %v4694_v42 }
  0x32   : > { %v313_v63 = vsel %vm4571_vm4, %v308_v54, %v312_v31  ;;  %v341_v0 = vor.u32 %v340_v56, %v336_v55  ;;  %v358_v12 = vshll.u32 %v4648_v52, 16  ;;  %3896 = vmatpush3.bf16.msra.mxu0 %v4530_v7  ;;  %v351_v21 = vrot.slane %v349_v61, 4  ;;  %v4699_v6 = vld [vmem:[%s4524_s9 + $0x58] sm:$0xf] }
  0x33   : > { %v323_v15 = vsel %vm4571_vm4, %v318_v58, %v322_v40  ;;  %v332_v17 = vrot.slane %v331_v59, 4  ;;  %v362_v22 = vshrl.u32 %v4648_v52, 16  ;;  %v354_v27 = vrot.slane %v352_v11, 5  ;;  %4296 = vmatprep.subr.msk.bf16.mxu0 %vm710_vm0, %v4535_v8  ;;  %v4689_v8 = vld [vmem:[%s4524_s9 + $0x50] sm:$0x1] }
  0x34   : > { %v4674_v25 = vcombine.low %v313_v63, %v323_v15  ;;  %v342_v26 = vrot.slane %v341_v0, 4  ;;  %v360_v29 = vrot.slane %v358_v12, 5  ;;  %v368_v31 = vshll.u32 %v4660_v5, 16  ;;  %v4712_v11 = vld [vmem:[%s4524_s9 + $0x5c] sm:$0x1] }
  0x35   : > { %v337_v7 = vsel %vm4571_vm4, %v332_v17, %v336_v55  ;;  %v364_v30 = vrot.slane %v362_v22, 4  ;;  %v373_v35 = vshrl.u32 %v4665_v13, 16  ;;  %v355_v37 = vor.u32 %v354_v27, %v351_v21  ;;  %v4716_v15 = vld [vmem:[%s4524_s9 + $0x60] sm:$0xf]  ;;  %v4721_v27 = vld [vmem:[%s4524_s9 + $0x64] sm:$0xf] }
  0x36   : > { %5615 = vst [vmem:[#allocation7_spill] sm:$0xff] %v4674_v25  ;;  %3867 = vmatprep.mubr.msk.bf16.mxu0 %vm661_vm3, %v4674_v25  ;;  %3732 = vmatmul.mubr.msk.bf16.gmra.mrb[4].mxu1 %vm661_vm3, %v4674_v25  ;;  %v347_v36 = vsel %vm4571_vm4, %v342_v26, %v346_v60  ;;  %v376_v40 = vshll.u32 %v4665_v13, 16  ;;  %v382_v41 = vshll.u32 %v4672_v24, 16  ;;  %v370_v47 = vrot.slane %v368_v31, 5  ;;  %v4933_v25 = vld [vmem:[%s4524_s9 + $0xa8] sm:$0xf] }
  0x37   : > { %v4696_v43 = vcombine.low %v337_v7, %v347_v36  ;;  %v365_v44 = vor.u32 %v364_v30, %v360_v29  ;;  %v375_v49 = vrot.slane %v373_v35, 4  ;;  %v356_v50 = vrot.slane %v355_v37, 4 }
  0x38   : > { %v378_v51 = vrot.slane %v376_v40, 5  ;;  %v384_v54 = vrot.slane %v382_v41, 5  ;;  %v386_v55 = vshrl.u32 %v4672_v24, 16  ;;  %v392_v58 = vshll.u32 %v4689_v8, 16 }
  0x39   : > { %5617 = vst [vmem:[#allocation9_spill] sm:$0xff] %v4696_v43  ;;  %3735 = vmatprep.mubr.msk.bf16.mxu1 %vm661_vm3, %v4696_v43  ;;  %v366_v56 = vrot.slane %v365_v44, 4  ;;  %v397_v59 = vshrl.u32 %v4694_v42, 16  ;;  %v400_v60 = vshll.u32 %v4694_v42, 16  ;;  %3868 = vmatmul.mubr.msk.bf16.gmra.mrb[4].mxu0 %vm661_vm3, %v4696_v43  ;;  %v361_v61 = vsel %vm4571_vm4, %v356_v50, %v360_v29 }
  0x3a   : > { %v379_v63 = vor.u32 %v378_v51, %v375_v49  ;;  %v388_v0 = vrot.slane %v386_v55, 4  ;;  %v406_v12 = vshll.u32 %v4699_v6, 16  ;;  %v394_v21 = vrot.slane %v392_v58, 5 }
  0x3b   : > { %v371_v17 = vsel %vm4571_vm4, %v366_v56, %v370_v47  ;;  %v399_v22 = vrot.slane %v397_v59, 4  ;;  %v402_v26 = vrot.slane %v400_v60, 5  ;;  %v410_v36 = vshrl.u32 %v4699_v6, 16  ;;  %v4735_v47 = vld [vmem:[%s4524_s9 + $0x68] sm:$0x1] }
  0x3c   : > { %v4723_v7 = vcombine.low %v361_v61, %v371_v17  ;;  %v380_v29 = vrot.slane %v379_v63, 4  ;;  %v389_v30 = vor.u32 %v388_v0, %v384_v54  ;;  %v408_v31 = vrot.slane %v406_v12, 5 }
  0x3d   : > { %v403_v35 = vor.u32 %v402_v26, %v399_v22  ;;  %v416_v37 = vshll.u32 %v4712_v11, 16  ;;  %v421_v40 = vshrl.u32 %v4716_v15, 16  ;;  %v424_v49 = vshll.u32 %v4716_v15, 16 }
  0x3e   : > { %5618 = vst [vmem:[#allocation10_spill] sm:$0xff] %v4723_v7  ;;  %3871 = vmatprep.mubr.msk.bf16.mxu0 %vm661_vm3, %v4723_v7  ;;  %3736 = vmatmul.mubr.msk.bf16.gmra.mrb[8].mxu1 %vm661_vm3, %v4723_v7  ;;  %v385_v41 = vsel %vm4571_vm4, %v380_v29, %v384_v54  ;;  %v390_v44 = vrot.slane %v389_v30, 4  ;;  %v430_v50 = vshll.u32 %v4721_v27, 16  ;;  %v412_v55 = vrot.slane %v410_v36, 4  ;;  %v4743_v54 = vld [vmem:[%s4524_s9 + $0x6c] sm:$0xf] }
  0x3f   : > { %v404_v51 = vrot.slane %v403_v35, 4  ;;  %v418_v56 = vrot.slane %v416_v37, 5  ;;  %v423_v58 = vrot.slane %v421_v40, 4  ;;  %v426_v60 = vrot.slane %v424_v49, 5  ;;  %v4759_v36 = vld [vmem:[%s4524_s9 + $0x70] sm:$0xf] }
  0x40   : > { %v395_v59 = vsel %vm4571_vm4, %v390_v44, %v394_v21  ;;  %v432_v61 = vrot.slane %v430_v50, 5  ;;  %v434_v63 = vshrl.u32 %v4721_v27, 16  ;;  %v413_v17 = vor.u32 %v412_v55, %v408_v31  ;;  %v4910_v7 = vld [vmem:[%s4524_s9 + $0xa0] sm:$0xf] }
  0x41   : > { %v4745_v0 = vcombine.low %v385_v41, %v395_v59  ;;  %v409_v12 = vsel %vm4571_vm4, %v404_v51, %v408_v31  ;;  %v440_v22 = vshll.u32 %v4735_v47, 16  ;;  %v427_v21 = vor.u32 %v426_v60, %v423_v58  ;;  %v4772_v51 = vld [vmem:[%s4524_s9 + $0x74] sm:$0x1] }
  0x42   : > { %v436_v29 = vrot.slane %v434_v63, 4  ;;  %v3255_v30 = vrot.slane %v4549_v16, 9  ;;  %v1195_v35 = vrot.slane %v4552_v18, 5  ;;  %v414_v31 = vrot.slane %v413_v17, 4 }
  0x43   : > { %5619 = vst [vmem:[#allocation11_spill] sm:$0xff] %v4745_v0  ;;  %3872 = vmatmul.mubr.msk.bf16.gmra.mrb[8].mxu0 %vm661_vm3, %v4745_v0  ;;  %3739 = vmatprep.mubr.msk.bf16.mxu1 %vm661_vm3, %v4745_v0  ;;  %v442_v37 = vrot.slane %v440_v22, 5  ;;  %v445_v40 = vshrl.u32 %v4743_v54, 16  ;;  %v448_v41 = vshll.u32 %v4743_v54, 16  ;;  %v428_v44 = vrot.slane %v427_v21, 4 }
  0x44   : > { %v437_v49 = vor.u32 %v436_v29, %v432_v61  ;;  %v1196_v16 = vsel %vm4752_vm7, %v3255_v30, %v1195_v35  ;;  %v1197_v18 = vrot.slane %v1195_v35, 4  ;;  %v419_v50 = vsel %vm4571_vm4, %v414_v31, %v418_v56  ;;  %v4784_v56 = vld [vmem:[%s4524_s9 + $0x78] sm:$0xf]  ;;  %v4800_v31 = vld [vmem:[%s4524_s9 + $0x7c] sm:$0xf] }
  0x45   : > { %v447_v55 = vrot.slane %v445_v40, 4  ;;  %v450_v58 = vrot.slane %v448_v41, 5  ;;  %v454_v59 = vshll.u32 %v4759_v36, 16  ;;  %v4775_v60 = vcombine.low %v409_v12, %v419_v50 }
  0x46   : > { %v433_v63 = vsel %vm4571_vm4, %v428_v44, %v432_v61  ;;  %v438_v17 = vrot.slane %v437_v49, 4  ;;  %v1199_v22 = vsel %vm4752_vm7, %v1197_v18, %v1198_v45  ;;  %v458_v35 = vshrl.u32 %v4759_v36, 16  ;;  %v4805_v49 = vld [vmem:[%s4524_s9 + $0x80] sm:$0x1] }
  0x47   : > { %5622 = vst [vmem:[#allocation12_spill] sm:$0xff] %v4775_v60  ;;  %v4786_v21 = vcombine.low %v1196_v16, %v1199_v22  ;;  %v451_v29 = vor.u32 %v450_v58, %v447_v55  ;;  %v456_v30 = vrot.slane %v454_v59, 5  ;;  %3875 = vmatprep.mubr.msk.bf16.mxu0 %vm661_vm3, %v4775_v60  ;;  %3740 = vmatmul.mubr.msk.bf16.gmra.mrb[12].mxu1 %vm661_vm3, %v4775_v60  ;;  %v464_v45 = vshll.u32 %v4772_v51, 16  ;;  %v4903_v60 = vld [vmem:[%s4524_s9 + $0x9c] sm:$0xf] }
  0x48   : > { %v443_v19 = vsel %vm4571_vm4, %v438_v17, %v442_v37  ;;  %v3256_v61 = vrot.slane %v4567_v33, 9  ;;  %v1204_v12 = vrot.slane %v1202_v1, 4  ;;  %v460_v44 = vrot.slane %v458_v35, 4 }
  0x49   : > { %5623 = vst [vmem:[#allocation13_spill] sm:$0xff] %v4786_v21  ;;  %v4802_v40 = vcombine.low %v433_v63, %v443_v19  ;;  %v452_v41 = vrot.slane %v451_v29, 4  ;;  %v469_v16 = vshrl.u32 %v4784_v56, 16  ;;  %v466_v18 = vrot.slane %v464_v45, 5  ;;  %v4831_v29 = vld [vmem:[%s4524_s9 + $0x84] sm:$0xf] }
  0x4a   : > { %v1203_v37 = vsel %vm4752_vm7, %v3256_v61, %v1202_v1  ;;  %v1206_v50 = vsel %vm4752_vm7, %v1204_v12, %v1205_v2  ;;  %v472_v55 = vshll.u32 %v4784_v56, 16  ;;  %v461_v59 = vor.u32 %v460_v44, %v456_v30 }
  0x4b   : > { %5624 = vst [vmem:[#allocation14_spill] sm:$0xff] %v4802_v40  ;;  %3876 = vmatmul.mubr.msk.bf16.gmra.mrb[12].mxu0 %vm661_vm3, %v4802_v40  ;;  %3743 = vmatprep.mubr.msk.bf16.mxu1 %vm661_vm3, %v4802_v40  ;;  %v457_v58 = vsel %vm4571_vm4, %v452_v41, %v456_v30  ;;  %v4823_v63 = vcombine.low %v1203_v37, %v1206_v50  ;;  %v471_v1 = vrot.slane %v469_v16, 4  ;;  %v478_v2 = vshll.u32 %v4800_v31, 16  ;;  %v4837_v16 = vld [vmem:[%s4524_s9 + $0x88] sm:$0xf] }
  0x4c   : > { %3897 = vmatprep.mubr.msk.bf16.mxu0 %vm661_vm3, %v4786_v21  ;;  %v474_v46 = vrot.slane %v472_v55, 5  ;;  %v482_v17 = vshrl.u32 %v4800_v31, 16  ;;  %v488_v22 = vshll.u32 %v4805_v49, 16  ;;  %v462_v35 = vrot.slane %v461_v59, 4 }
  0x4d   : > { %5625 = vst [vmem:[#allocation15_spill] sm:$0xff] %v4823_v63  ;;  %v3257_v30 = vrot.slane %v4594_v57, 9  ;;  %v1209_v19 = vrot.slane %v4599_v62, 5  ;;  %v1212_v45 = vrot.slane %v4607_v4, 5  ;;  %v480_v12 = vrot.slane %v478_v2, 5 }
  0x4e   : > { %v475_v61 = vor.u32 %v474_v46, %v471_v1  ;;  %v484_v41 = vrot.slane %v482_v17, 4  ;;  %v490_v44 = vrot.slane %v488_v22, 5  ;;  %v467_v37 = vsel %vm4571_vm4, %v462_v35, %v466_v18  ;;  %v4847_v1 = vld [vmem:[%s4524_s9 + $0x8c] sm:$0x1] }
  0x4f   : > { %v1210_v50 = vsel %vm4752_vm7, %v3257_v30, %v1209_v19  ;;  %v1211_v55 = vrot.slane %v1209_v19, 4  ;;  %v493_v59 = vshrl.u32 %v4831_v29, 16  ;;  %v4844_v3 = vcombine.low %v457_v58, %v467_v37 }
  0x50   : > { %v476_v40 = vrot.slane %v475_v61, 4  ;;  %v485_v4 = vor.u32 %v484_v41, %v480_v12  ;;  %v496_v46 = vshll.u32 %v4831_v29, 16  ;;  %v502_v18 = vshll.u32 %v4837_v16, 16  ;;  %v4861_v61 = vld [vmem:[%s4524_s9 + $0x90] sm:$0xf] }
  0x51   : > { %5626 = vst [vmem:[#allocation16_spill] sm:$0xff] %v4844_v3  ;;  %v1213_v2 = vsel %vm4752_vm7, %v1211_v55, %v1212_v45  ;;  %v495_v17 = vrot.slane %v493_v59, 4  ;;  %v506_v22 = vshrl.u32 %v4837_v16, 16  ;;  %3744 = vmatmul.mubr.msk.bf16.gmra.mrb[16].mxu1 %vm661_vm3, %v4844_v3  ;;  %v4866_v45 = vld [vmem:[%s5575_s1 + $0x1c] sm:$0xf]  ;;  %v1216_v59 = vrot.slane %v4625_v28, 5 }
  0x52   : > { %v481_v58 = vsel %vm4571_vm4, %v476_v40, %v480_v12  ;;  %v486_v35 = vrot.slane %v485_v4, 4  ;;  %v4858_v30 = vcombine.low %v1210_v50, %v1213_v2  ;;  %v498_v19 = vrot.slane %v496_v46, 5  ;;  %5628 = vst [vmem:[#allocation18_spill] sm:$0xff] %v4866_v45  ;;  %v4880_v46 = vld [vmem:[%s4524_s9 + $0x94] sm:$0xf] }
  0x53   : > { %3898 = vmatmul.mubr.msk.bf16.vlgmr.msra.gmra.mrb[0].mxu0 %vm661_vm3, %v4823_v63  ;;  %v504_v41 = vrot.slane %v502_v18, 5  ;;  %v508_v37 = vrot.slane %v506_v22, 4  ;;  %v512_v40 = vshll.u32 %v4847_v1, 16  ;;  %v3258_v12 = vrot.slane %v4613_v14, 9  ;;  %v4885_v3 = vld [vmem:[%s4524_s9 + $0x98] sm:$0x1] }
  0x54   : > { %5627 = vst [vmem:[#allocation17_spill] sm:$0xff] %v4858_v30  ;;  %3930 = vmatpush3.bf16.msra.mxu0 %v4559_v20  ;;  %v491_v50 = vsel %vm4571_vm4, %v486_v35, %v490_v44  ;;  %3901 = vmatprep.mubr.msk.bf16.mxu0 %vm661_vm3, %v4858_v30  ;;  %v499_v55 = vor.u32 %v498_v19, %v495_v17  ;;  %v1219_v4 = vrot.slane %v4632_v32, 5  ;;  %v517_v20 = vshrl.u32 %v4861_v61, 16 }
  0x55   : > { %v4882_v2 = vcombine.low %v481_v58, %v491_v50  ;;  %v509_v18 = vor.u32 %v508_v37, %v504_v41  ;;  %v514_v22 = vrot.slane %v512_v40, 5  ;;  %4297 = vmatprep.subr.msk.bf16.mxu0 %vm710_vm0, %v4866_v45  ;;  %v1217_v17 = vsel %vm4752_vm7, %v3258_v12, %v1216_v59 }
  0x56   : > { %v500_v44 = vrot.slane %v499_v55, 4  ;;  %v1218_v35 = vrot.slane %v1216_v59, 4  ;;  %v520_v32 = vshll.u32 %v4861_v61, 16  ;;  %v519_v19 = vrot.slane %v517_v20, 4 }
  0x57   : > { %5629 = vst [vmem:[#allocation19_spill] sm:$0xff] %v4882_v2  ;;  %3747 = vmatprep.mubr.msk.bf16.mxu1 %vm661_vm3, %v4882_v2  ;;  %v510_v58 = vrot.slane %v509_v18, 4  ;;  %v526_v37 = vshll.u32 %v4880_v46, 16  ;;  %v530_v40 = vshrl.u32 %v4880_v46, 16  ;;  %v536_v59 = vshll.u32 %v4885_v3, 16 }
  0x58   : > { %v505_v50 = vsel %vm4571_vm4, %v500_v44, %v504_v41  ;;  %v1220_v55 = vsel %vm4752_vm7, %v1218_v35, %v1219_v4  ;;  %v522_v12 = vrot.slane %v520_v32, 5  ;;  %v3259_v4 = vrot.slane %v4640_v48, 9 }
  0x59   : > { %v515_v2 = vsel %vm4571_vm4, %v510_v58, %v514_v22  ;;  %v4907_v18 = vcombine.low %v1217_v17, %v1220_v55  ;;  %v528_v20 = vrot.slane %v526_v37, 5  ;;  %v532_v0 = vrot.slane %v530_v40, 4  ;;  %v4923_v58 = vld [vmem:[%s4524_s9 + $0xa4] sm:$0x1] }
  0x5a   : > { %v4912_v43 = vcombine.low %v505_v50, %v515_v2  ;;  %v523_v41 = vor.u32 %v522_v12, %v519_v19  ;;  %v538_v44 = vrot.slane %v536_v59, 5  ;;  %v1223_v32 = vrot.slane %v4648_v52, 5 }
  0x5b   : > { %5630 = vst [vmem:[#allocation20_spill] sm:$0xff] %v4907_v18  ;;  %3902 = vmatmul.mubr.msk.bf16.gmra.mrb[4].mxu0 %vm661_vm3, %v4907_v18  ;;  %v533_v35 = vor.u32 %v532_v0, %v528_v20  ;;  %v1226_v22 = vrot.slane %v4660_v5, 5  ;;  %v541_v17 = vshrl.u32 %v4903_v60, 16  ;;  %v544_v19 = vshll.u32 %v4903_v60, 16 }
  0x5c   : > { %5631 = vst [vmem:[#allocation21_spill] sm:$0xff] %v4912_v43  ;;  %3748 = vmatmul.mubr.msk.bf16.gmra.mrb[20].mxu1 %vm661_vm3, %v4912_v43  ;;  %v524_v2 = vrot.slane %v523_v41, 4  ;;  %v550_v37 = vshll.u32 %v4910_v7, 16  ;;  %v554_v0 = vshrl.u32 %v4910_v7, 16  ;;  %v1224_v5 = vsel %vm4752_vm7, %v3259_v4, %v1223_v32 }
  0x5d   : > { %v534_v40 = vrot.slane %v533_v35, 4  ;;  %v1225_v50 = vrot.slane %v1223_v32, 4  ;;  %v543_v55 = vrot.slane %v541_v17, 4  ;;  %v546_v59 = vrot.slane %v544_v19, 5  ;;  %v4942_v32 = vld [vmem:[%s4524_s9 + $0xac] sm:$0xf] }
  0x5e   : > { %v529_v12 = vsel %vm4571_vm4, %v524_v2, %v528_v20  ;;  %v552_v41 = vrot.slane %v550_v37, 5  ;;  %v556_v43 = vrot.slane %v554_v0, 4  ;;  %v560_v35 = vshll.u32 %v4923_v58, 16 }
  0x5f   : > { %v539_v53 = vsel %vm4571_vm4, %v534_v40, %v538_v44  ;;  %v1227_v18 = vsel %vm4752_vm7, %v1225_v50, %v1226_v22  ;;  %v3260_v4 = vrot.slane %v4665_v13, 9  ;;  %v547_v2 = vor.u32 %v546_v59, %v543_v55 }
  0x60   : > { %v4944_v17 = vcombine.low %v529_v12, %v539_v53  ;;  %v4946_v20 = vcombine.low %v1224_v5, %v1227_v18  ;;  %v557_v19 = vor.u32 %v556_v43, %v552_v41  ;;  %v562_v37 = vrot.slane %v560_v35, 5  ;;  %v4956_v18 = vld [vmem:[%s4524_s9 + $0xb0] sm:$0x1] }
  0x61   : > { %v1230_v0 = vrot.slane %v4672_v24, 5  ;;  %v1233_v44 = vrot.slane %v4689_v8, 5  ;;  %v565_v22 = vshrl.u32 %v4933_v25, 16  ;;  %v548_v53 = vrot.slane %v547_v2, 4 }
  0x62   : > { %5632 = vst [vmem:[#allocation22_spill] sm:$0xff] %v4944_v17  ;;  %5633 = vst [vmem:[#allocation23_spill] sm:$0xff] %v4946_v20  ;;  %3751 = vmatprep.mubr.msk.bf16.mxu1 %vm661_vm3, %v4944_v17  ;;  %3905 = vmatprep.mubr.msk.bf16.mxu0 %vm661_vm3, %v4946_v20  ;;  %v558_v40 = vrot.slane %v557_v19, 4  ;;  %v568_v43 = vshll.u32 %v4933_v25, 16  ;;  %v574_v5 = vshll.u32 %v4942_v32, 16  ;;  %v578_v12 = vshrl.u32 %v4942_v32, 16 }
  0x63   : > { %v1231_v8 = vsel %vm4752_vm7, %v3260_v4, %v1230_v0  ;;  %v1232_v50 = vrot.slane %v1230_v0, 4  ;;  %v567_v55 = vrot.slane %v565_v22, 4  ;;  %v553_v59 = vsel %vm4571_vm4, %v548_v53, %v552_v41  ;;  %v4968_v17 = vld [vmem:[%s4524_s9 + $0xb4] sm:$0xf]  ;;  %v4980_v53 = vld [vmem:[%s4524_s9 + $0xb8] sm:$0xf] }
  0x64   : > { %v563_v35 = vsel %vm4571_vm4, %v558_v40, %v562_v37  ;;  %v570_v2 = vrot.slane %v568_v43, 5  ;;  %v576_v19 = vrot.slane %v574_v5, 5  ;;  %v580_v0 = vrot.slane %v578_v12, 4 }
  0x65   : > { %v4970_v20 = vcombine.low %v553_v59, %v563_v35  ;;  %v1234_v4 = vsel %vm4752_vm7, %v1232_v50, %v1233_v44  ;;  %v584_v22 = vshll.u32 %v4956_v18, 16  ;;  %v3261_v41 = vrot.slane %v4694_v42, 9  ;;  %v4986_v44 = vld [vmem:[%s4524_s9 + $0xbc] sm:$0x1] }
  0x66   : > { %v4975_v30 = vcombine.low %v1231_v8, %v1234_v4  ;;  %v571_v63 = vor.u32 %v570_v2, %v567_v55  ;;  %v1237_v37 = vrot.slane %v4699_v6, 5  ;;  %v581_v40 = vor.u32 %v580_v0, %v576_v19 }
  0x67   : > { %5634 = vst [vmem:[#allocation24_spill] sm:$0xff] %v4970_v20  ;;  %3752 = vmatmul.mubr.msk.bf16.gmra.mrb[24].mxu1 %vm661_vm3, %v4970_v20  ;;  %v586_v43 = vrot.slane %v584_v22, 5  ;;  %v1240_v5 = vrot.slane %v4712_v11, 5  ;;  %v589_v50 = vshrl.u32 %v4968_v17, 16  ;;  %v592_v59 = vshll.u32 %v4968_v17, 16 }
  0x68   : > { %5635 = vst [vmem:[#allocation25_spill] sm:$0xff] %v4975_v30  ;;  %3906 = vmatmul.mubr.msk.bf16.gmra.mrb[8].mxu0 %vm661_vm3, %v4975_v30  ;;  %v572_v8 = vrot.slane %v571_v63, 4  ;;  %v1238_v55 = vsel %vm4752_vm7, %v3261_v41, %v1237_v37  ;;  %v1239_v12 = vrot.slane %v1237_v37, 4  ;;  %v582_v35 = vrot.slane %v581_v40, 4 }
  0x69   : > { %v591_v2 = vrot.slane %v589_v50, 4  ;;  %v598_v4 = vshll.u32 %v4980_v53, 16  ;;  %v602_v11 = vshrl.u32 %v4980_v53, 16  ;;  %v594_v20 = vrot.slane %v592_v59, 5 }
  0x6a   : > { %v577_v0 = vsel %vm4571_vm4, %v572_v8, %v576_v19  ;;  %v1241_v22 = vsel %vm4752_vm7, %v1239_v12, %v1240_v5  ;;  %v608_v63 = vshll.u32 %v4986_v44, 16  ;;  %v587_v41 = vsel %vm4571_vm4, %v582_v35, %v586_v43 }
  0x6b   : > { %v5003_v37 = vcombine.low %v1238_v55, %v1241_v22  ;;  %v600_v40 = vrot.slane %v598_v4, 5  ;;  %v604_v50 = vrot.slane %v602_v11, 4  ;;  %v5005_v30 = vcombine.low %v577_v0, %v587_v41 }
  0x6c   : > { %v595_v21 = vor.u32 %v594_v20, %v591_v2  ;;  %v610_v45 = vrot.slane %v608_v63, 5  ;;  %v3262_v42 = vrot.slane %v4716_v15, 9  ;;  %v1244_v5 = vrot.slane %v4721_v27, 5 }
  0x6d   : > { %3909 = vmatprep.mubr.msk.bf16.mxu0 %vm661_vm3, %v5003_v37  ;;  %v605_v19 = vor.u32 %v604_v50, %v600_v40  ;;  %v1247_v8 = vrot.slane %v4735_v47, 5  ;;  %v3263_v43 = vrot.slane %v4743_v54, 9  ;;  %3755 = vmatprep.mubr.msk.bf16.mxu1 %vm661_vm3, %v5005_v30  ;;  %v3222_v20 = vcombine.low %v4538_v9, %v4541_v10 }
  0x6e   : > { %v596_v55 = vrot.slane %v595_v21, 4  ;;  %v1251_v12 = vrot.slane %v4759_v36, 5  ;;  %v1254_v59 = vrot.slane %v4772_v51, 5  ;;  %v1245_v2 = vsel %vm4752_vm7, %v3262_v42, %v1244_v5 }
  0x6f   : > { %v606_v35 = vrot.slane %v605_v19, 4  ;;  %v1246_v4 = vrot.slane %v1244_v5, 4  ;;  %v1258_v47 = vrot.slane %v4800_v31, 5  ;;  %v3264_v9 = vrot.slane %v4784_v56, 9 }
  0x70   : > { %v601_v11 = vsel %vm4571_vm4, %v596_v55, %v600_v40  ;;  %v1252_v21 = vsel %vm4752_vm7, %v3263_v43, %v1251_v12  ;;  %v1253_v0 = vrot.slane %v1251_v12, 4  ;;  %v1261_v42 = vrot.slane %v4805_v49, 5 }
  0x71   : > { %v611_v10 = vsel %vm4571_vm4, %v606_v35, %v610_v45  ;;  %v1248_v51 = vsel %vm4752_vm7, %v1246_v4, %v1247_v8  ;;  %v1260_v22 = vrot.slane %v1258_v47, 4  ;;  %v3265_v19 = vrot.slane %v4831_v29, 9 }
  0x72   : > { %v5032_v63 = vcombine.low %v601_v11, %v611_v10  ;;  %v5034_v41 = vcombine.low %v1245_v2, %v1248_v51  ;;  %v1255_v40 = vsel %vm4752_vm7, %v1253_v0, %v1254_v59  ;;  %v1265_v5 = vrot.slane %v4837_v16, 5 }
  0x73   : > { %v5038_v50 = vcombine.low %v1252_v21, %v1255_v40  ;;  %v1268_v49 = vrot.slane %v4847_v1, 5  ;;  %v1259_v45 = vsel %vm4752_vm7, %v3264_v9, %v1258_v47  ;;  %v1262_v8 = vsel %vm4752_vm7, %v1260_v22, %v1261_v42 }
  0x74   : > { %3756 = vmatmul.mubr.msk.bf16.gmra.mrb[28].mxu1 %vm661_vm3, %v5032_v63  ;;  %3910 = vmatmul.mubr.msk.bf16.gmra.mrb[12].mxu0 %vm661_vm3, %v5034_v41  ;;  %v1267_v43 = vrot.slane %v1265_v5, 4  ;;  %v1272_v55 = vrot.slane %v4880_v46, 5  ;;  %v1279_v12 = vrot.slane %v4910_v7, 5  ;;  %v1266_v59 = vsel %vm4752_vm7, %v3265_v19, %v1265_v5 }
  0x75   : > { %3761 = vmatprep.mubr.msk.bf16.mxu1 %vm661_vm3, %v3222_v20  ;;  %3913 = vmatprep.mubr.msk.bf16.mxu0 %vm661_vm3, %v5038_v50  ;;  %v5060_v20 = vcombine.low %v1259_v45, %v1262_v8  ;;  %v3266_v35 = vrot.slane %v4861_v61, 9  ;;  %v1275_v4 = vrot.slane %v4885_v3, 5  ;;  %v5066_v47 = vcombine.low %v4567_v33, %v4580_v39  ;;  %v5078_v3 = vld [vmem:[%s5575_s1 + $0xc] sm:$0xf] }
  0x76   : > { %v1269_v1 = vsel %vm4752_vm7, %v1267_v43, %v1268_v49  ;;  %v1274_v2 = vrot.slane %v1272_v55, 4  ;;  %v3267_v11 = vrot.slane %v4903_v60, 9  ;;  %v1396_v21 = vsel %vm710_vm0, %v4620_v23, 0 }
  0x77   : > { %v5071_v0 = vcombine.low %v1266_v59, %v1269_v1  ;;  %v1281_v9 = vrot.slane %v1279_v12, 4  ;;  %v1282_v10 = vrot.slane %v4923_v58, 5  ;;  %v1286_v51 = vrot.slane %v4942_v32, 5 }
  0x78   : > { %v1273_v33 = vsel %vm4752_vm7, %v3266_v35, %v1272_v55  ;;  %v1276_v39 = vsel %vm4752_vm7, %v1274_v2, %v1275_v4  ;;  %v5092_v23 = vcombine.low %v4594_v57, %v4599_v62  ;;  %v1280_v58 = vsel %vm4752_vm7, %v3267_v11, %v1279_v12 }
  0x79   : > { %v5098_v22 = vcombine.low %v4716_v15, %v4721_v27  ;;  %v1283_v42 = vsel %vm4752_vm7, %v1281_v9, %v1282_v10  ;;  %v3268_v40 = vrot.slane %v4933_v25, 9  ;;  %v1293_v19 = vrot.slane %v4980_v53, 5 }
  0x7a   : > { %v5108_v57 = vcombine.low %v4743_v54, %v4759_v36  ;;  %v5112_v62 = vcombine.low %v1273_v33, %v1276_v39  ;;  %v1288_v15 = vrot.slane %v1286_v51, 4  ;;  %v1289_v27 = vrot.slane %v4956_v18, 5  ;;  %v220_v18 = vld [vmem:[%s4524_s9 + $0xc8] sm:$0x1] }
  0x7b   : > { %v5117_v5 = vcombine.low %v4784_v56, %v4800_v31  ;;  %v5121_v49 = vcombine.low %v4831_v29, %v4837_v16  ;;  %v5125_v54 = vcombine.low %v4861_v61, %v4880_v46  ;;  %v5129_v36 = vcombine.low %v4903_v60, %v4910_v7  ;;  %v5148_v61 = vld [vmem:[%s4524_s9 + $0xc4] sm:$0xf] }
  0x7c   : > { %3762 = vmatmul.mubr.msk.bf16.vlgmr.msra.gmra.mrb[0].mxu1 %vm661_vm3, %v4577_v38  ;;  %3914 = vmatmul.mubr.msk.bf16.gmra.mrb[16].mxu0 %vm661_vm3, %v5060_v20  ;;  %v5133_v45 = vcombine.low %v4933_v25, %v4942_v32  ;;  %v5137_v56 = vcombine.low %v4613_v14, %v4625_v28  ;;  %v5139_v31 = vcombine.low %v1280_v58, %v1283_v42  ;;  %v3269_v16 = vrot.slane %v4968_v17, 9  ;;  %v5636_v42 = vld [vmem:[#allocation8_spill] sm:$0xff] }
  0x7d   : > { %3794 = vmatpush3.bf16.msra.mxu1 %v1396_v21  ;;  %3765 = vmatprep.mubr.msk.bf16.mxu1 %vm661_vm3, %v5066_v47  ;;  %v5143_v29 = vcombine.low %v4968_v17, %v4980_v53  ;;  %v1295_v7 = vrot.slane %v1293_v19, 4  ;;  %v1296_v60 = vrot.slane %v4986_v44, 5  ;;  %v1287_v14 = vsel %vm4752_vm7, %v3268_v40, %v1286_v51  ;;  %v5168_v17 = vld [vmem:[%s4524_s9 + $0xc0] sm:$0xf] }
  0x7e   : > { %3917 = vmatprep.mubr.msk.bf16.mxu0 %vm661_vm3, %v5071_v0  ;;  %4292 = vmatprep.subr.msk.bf16.mxu1 %vm710_vm0, %v5078_v3  ;;  %v1290_v28 = vsel %vm4752_vm7, %v1288_v15, %v1289_v27  ;;  %v2026_v25 = vrot.slane %v5148_v61, 5  ;;  %v1294_v46 = vsel %vm4752_vm7, %v3269_v16, %v1293_v19  ;;  %v5173_v53 = vcombine.low %v4640_v48, %v4648_v52 }
  0x7f   : > { %v1297_v32 = vsel %vm4752_vm7, %v1295_v7, %v1296_v60  ;;  %v5175_v44 = vcombine.low %v1287_v14, %v1290_v28  ;;  %v5179_v8 = vcombine.low %v4665_v13, %v4672_v24  ;;  %v1797_v43 = vshrl.u32 %v5168_v17, 16  ;;  %v2674_v60 = vld [vmem:[%s5575_s1 + $0x20] sm:$0xf]  ;;  %v4359_v14 = vld [vmem:[%s4524_s9 + $0x4] sm:$0xf] }
  0x80   : > { %v1800_v55 = vshll.u32 %v5168_v17, 16  ;;  %v1806_v12 = vshll.u32 %v5148_v61, 16  ;;  %v1810_v59 = vshrl.u32 %v5148_v61, 16  ;;  %v5185_v1 = vcombine.low %v1294_v46, %v1297_v32  ;;  %v4361_v32 = vld [vmem:[%s4524_s9] sm:$0xf] }
  0x81   : > { %v3336_v35 = vrot.slane %v5168_v17, 9  ;;  %v2028_v48 = vrot.slane %v2026_v25, 4  ;;  %v2029_v52 = vrot.slane %v220_v18, 5  ;;  %v1799_v2 = vrot.slane %v1797_v43, 4 }
  0x82   : > { %v1802_v4 = vrot.slane %v1800_v55, 5  ;;  %v1808_v11 = vrot.slane %v1806_v12, 5  ;;  %v1812_v21 = vrot.slane %v1810_v59, 4  ;;  %v1816_v9 = vshll.u32 %v220_v18, 16 }
  0x83   : > { %v2027_v10 = vsel %vm4752_vm7, %v3336_v35, %v2026_v25  ;;  %v2030_v51 = vsel %vm4752_vm7, %v2028_v48, %v2029_v52  ;;  %v5202_v40 = vcombine.low %v5636_v42, %v4699_v6  ;;  %v5637_v6 = vld [vmem:[#allocation18_spill] sm:$0xff]  ;;  %v1188_v28 = vrot.slane %v4359_v14, 5  ;;  %v5638_v48 = vld [vmem:[#allocation13_spill] sm:$0xff]  ;;  %v5639_v52 = vld [vmem:[#allocation15_spill] sm:$0xff] }
  0x84   : > { %3766 = vmatmul.mubr.msk.bf16.gmra.mrb[4].mxu1 %vm661_vm3, %v5092_v23  ;;  %3918 = vmatmul.mubr.msk.bf16.gmra.mrb[20].mxu0 %vm661_vm3, %v5112_v62  ;;  %v1803_v13 = vor.u32 %v1802_v4, %v1799_v2  ;;  %v1813_v24 = vor.u32 %v1812_v21, %v1808_v11  ;;  %v1818_v58 = vrot.slane %v1816_v9, 5  ;;  %v5204_v19 = vcombine.low %v2027_v10, %v2030_v51  ;;  %v4360_v25 = vld [vmem:[%s4524_s9 + $0x8] sm:$0x1]  ;;  %v4362_v2 = vld [vmem:[%s5575_s1 + $0x10] sm:$0xf]  ;;  %v5641_v4 = vld [vmem:[#allocation20_spill] sm:$0xff] }
  0x85   : > { %3769 = vmatprep.mubr.msk.bf16.mxu1 %vm661_vm3, %v5137_v56  ;;  %3921 = vmatprep.mubr.msk.bf16.mxu0 %vm661_vm3, %v5139_v31  ;;  %v2471_v7 = vsel %vm710_vm0, %v5637_v6, 0  ;;  %v1191_v46 = vrot.slane %v4360_v25, 5  ;;  %v3254_v18 = vrot.slane %v4361_v32, 9  ;;  %v1190_v43 = vrot.slane %v1188_v28, 4  ;;  %v5642_v21 = vld [vmem:[#allocation23_spill] sm:$0xff]  ;;  %v5649_v42 = vld [vmem:[#allocation12_spill] sm:$0xff] }
  0x86   : > { %v1804_v33 = vrot.slane %v1803_v13, 4  ;;  %v1814_v39 = vrot.slane %v1813_v24, 4  ;;  %v1601_v35 = vsel %vm710_vm0, %v5078_v3, 0  ;;  %v5640_v3 = vld [vmem:[#allocation17_spill] sm:$0xff]  ;;  %v5299_v24 = vld [vmem:[%s4524_s9 + $0xcc] sm:$0xf] }
  0x87   : > { %v1189_v55 = vsel %vm4752_vm7, %v3254_v18, %v1188_v28  ;;  %v1192_v12 = vsel %vm4752_vm7, %v1190_v43, %v1191_v46  ;;  %v5643_v13 = vld [vmem:[#allocation25_spill] sm:$0xff]  ;;  %v5302_v9 = vld [vmem:[%s4524_s9 + $0xd0] sm:$0xf]  ;;  %v2682_v10 = vsel %vm710_vm0, %v2674_v60, 0  ;;  %v2443_v14 = vshll.u32 %v5299_v24, 16  ;;  %v5655_v46 = vld [vmem:[#allocation22_spill] sm:$0xff] }
  0x88   : > { %v1809_v15 = vsel %vm4571_vm4, %v1804_v33, %v1808_v11  ;;  %v1819_v27 = vsel %vm4571_vm4, %v1814_v39, %v1818_v58  ;;  %v3270_v59 = vcombine.low %v1189_v55, %v1192_v12  ;;  %v5288_v11 = vcombine.low %v5168_v17, %v5148_v61  ;;  %v5644_v17 = vld [vmem:[#allocation6_spill] sm:$0xff]  ;;  %v5645_v51 = vld [vmem:[#allocation7_spill] sm:$0xff]  ;;  %v5646_v33 = vld [vmem:[#allocation9_spill] sm:$0xff] }
  0x89   : > { %v5210_v16 = vcombine.low %v1809_v15, %v1819_v27  ;;  %v3354_v61 = vcombine.low %v5299_v24, %v5302_v9  ;;  %v5647_v39 = vld [vmem:[#allocation10_spill] sm:$0xff]  ;;  %v5648_v58 = vld [vmem:[#allocation11_spill] sm:$0xff]  ;;  %v5651_v27 = vld [vmem:[#allocation16_spill] sm:$0xff]  ;;  %v2453_v28 = vshrl.u32 %v5302_v9, 16  ;;  %v2445_v32 = vrot.slane %v2443_v14, 5 }
  0x8a   : > { %v5650_v15 = vld [vmem:[#allocation14_spill] sm:$0xff]  ;;  %v5652_v6 = vld [vmem:[#allocation19_spill] sm:$0xff]  ;;  %v5654_v25 = vld [vmem:[#allocation5_spill] sm:$0xff]  ;;  %v2669_v34 = vrot.slane %v5302_v9, 5 }
  0x8b   : > { %v2455_v43 = vrot.slane %v2453_v28, 4  ;;  %v223_v55 = vld [vmem:[%s4524_s9 + $0xd4] sm:$0x1]  ;;  %v5656_v12 = vld [vmem:[#allocation24_spill] sm:$0xff]  ;;  %s3476_s9 = sshll.u32 %s4471_s16, 11  ;;  %s5533_s16 = scalar_lea.sflag [#allocation3], %s161_s6 }
  0x8c   : > { %3770 = vmatmul.mubr.msk.bf16.gmra.mrb[8].mxu1 %vm661_vm3, %v5173_v53  ;;  %3922 = vmatmul.mubr.msk.bf16.gmra.mrb[24].mxu0 %vm661_vm3, %v5175_v44  ;;  %s5525_s19 = scalar_lea.hbm %s5577_s3, %s3476_s9 }
  0x8d   : > { %3773 = vmatprep.mubr.msk.bf16.mxu1 %vm661_vm3, %v5179_v8  ;;  %3925 = vmatprep.mubr.msk.bf16.mxu0 %vm661_vm3, %v5185_v1 }
  0x94   : > { %3774 = vmatmul.mubr.msk.bf16.gmra.mrb[12].mxu1 %vm661_vm3, %v5202_v40  ;;  %3926 = vmatmul.mubr.msk.bf16.gmra.mrb[28].mxu0 %vm661_vm3, %v5204_v19 }
  0x95   : > { %3777 = vmatprep.mubr.msk.bf16.mxu1 %vm661_vm3, %v5098_v22  ;;  %3931 = vmatprep.mubr.msk.bf16.mxu0 %vm661_vm3, %v5066_v47 }
  0x9c   : > { %3778 = vmatmul.mubr.msk.bf16.gmra.mrb[16].mxu1 %vm661_vm3, %v5108_v57  ;;  %3932 = vmatmul.mubr.msk.bf16.vlgmr.msra.gmra.mrb[0].mxu0 %vm661_vm3, %v5092_v23 }
  0x9d   : > { %3964 = vmatpush3.bf16.msra.mxu0 %v2471_v7  ;;  %3781 = vmatprep.mubr.msk.bf16.mxu1 %vm661_vm3, %v5117_v5  ;;  %v5653_v7 = vld [vmem:[#allocation21_spill] sm:$0xff] }
  0x9e   : > { %3935 = vmatprep.mubr.msk.bf16.mxu0 %vm661_vm3, %v5137_v56  ;;  %4298 = vmatprep.subr.msk.bf16.mxu0 %vm710_vm0, %v2674_v60  ;;  %v2440_v60 = vshrl.u32 %v5299_v24, 16 }
  0xa4   : > { %3782 = vmatmul.mubr.msk.bf16.gmra.mrb[20].mxu1 %vm661_vm3, %v5121_v49  ;;  %3936 = vmatmul.mubr.msk.bf16.gmra.mrb[4].mxu0 %vm661_vm3, %v5173_v53 }
  0xa5   : > { %3785 = vmatprep.mubr.msk.bf16.mxu1 %vm661_vm3, %v5125_v54  ;;  %3939 = vmatprep.mubr.msk.bf16.mxu0 %vm661_vm3, %v5179_v8 }
  0xac   : > { %3786 = vmatmul.mubr.msk.bf16.gmra.mrb[24].mxu1 %vm661_vm3, %v5129_v36  ;;  %3940 = vmatmul.mubr.msk.bf16.gmra.mrb[8].mxu0 %vm661_vm3, %v5202_v40 }
  0xad   : > { %3789 = vmatprep.mubr.msk.bf16.mxu1 %vm661_vm3, %v5133_v45  ;;  %3943 = vmatprep.mubr.msk.bf16.mxu0 %vm661_vm3, %v5098_v22 }
  0xb4   : > { %3790 = vmatmul.mubr.msk.bf16.gmra.mrb[28].mxu1 %vm661_vm3, %v5143_v29  ;;  %3944 = vmatmul.mubr.msk.bf16.gmra.mrb[12].mxu0 %vm661_vm3, %v5108_v57 }
  0xb5   : > { %3795 = vmatprep.mubr.msk.bf16.mxu1 %vm661_vm3, %v3270_v59  ;;  %3947 = vmatprep.mubr.msk.bf16.mxu0 %vm661_vm3, %v5117_v5 }
  0xbc   : > { %3796 = vmatmul.mubr.msk.bf16.vlgmr.msra.gmra.mrb[0].mxu1 %vm661_vm3, %v5638_v48  ;;  %3948 = vmatmul.mubr.msk.bf16.gmra.mrb[16].mxu0 %vm661_vm3, %v5121_v49 }
  0xbd   : > { %3828 = vmatpush3.bf16.msra.mxu1 %v1601_v35  ;;  %3799 = vmatprep.mubr.msk.bf16.mxu1 %vm661_vm3, %v5639_v52  ;;  %v2459_v35 = vshll.u32 %v223_v55, 16 }
  0xbe   : > { %3951 = vmatprep.mubr.msk.bf16.mxu0 %vm661_vm3, %v5125_v54  ;;  %4294 = vmatprep.subr.msk.bf16.mxu1 %vm710_vm0, %v4362_v2 }
  0xc4   : > { %3800 = vmatmul.mubr.msk.bf16.gmra.mrb[4].mxu1 %vm661_vm3, %v5640_v3  ;;  %3952 = vmatmul.mubr.msk.bf16.gmra.mrb[20].mxu0 %vm661_vm3, %v5129_v36 }
  0xc5   : > { %3803 = vmatprep.mubr.msk.bf16.mxu1 %vm661_vm3, %v5641_v4  ;;  %3955 = vmatprep.mubr.msk.bf16.mxu0 %vm661_vm3, %v5133_v45 }
  0xcc   : > { %3804 = vmatmul.mubr.msk.bf16.gmra.mrb[8].mxu1 %vm661_vm3, %v5642_v21  ;;  %3956 = vmatmul.mubr.msk.bf16.gmra.mrb[24].mxu0 %vm661_vm3, %v5143_v29 }
  0xcd   : > { %3807 = vmatprep.mubr.msk.bf16.mxu1 %vm661_vm3, %v5643_v13  ;;  %3959 = vmatprep.mubr.msk.bf16.mxu0 %vm661_vm3, %v5288_v11 }
  0xd4   : > { %3808 = vmatmul.mubr.msk.bf16.gmra.mrb[12].mxu1 %vm661_vm3, %v5003_v37  ;;  %3960 = vmatmul.mubr.msk.bf16.gmra.mrb[28].mxu0 %vm661_vm3, %v3354_v61  ;;  %v2461_v61 = vrot.slane %v2459_v35, 5 }
  0xd5   : > { %3811 = vmatprep.mubr.msk.bf16.mxu1 %vm661_vm3, %v5034_v41  ;;  %3965 = vmatprep.mubr.msk.bf16.mxu0 %vm661_vm3, %v5644_v17 }
  0xdc   : > { %3812 = vmatmul.mubr.msk.bf16.gmra.mrb[16].mxu1 %vm661_vm3, %v5038_v50  ;;  %3966 = vmatmul.mubr.msk.bf16.vlgmr.msra.gmra.mrb[0].mxu0 %vm661_vm3, %v5645_v51 }
  0xdd   : > { %3998 = vmatpush3.bf16.msra.mxu0 %v2682_v10  ;;  %3815 = vmatprep.mubr.msk.bf16.mxu1 %vm661_vm3, %v5060_v20 }
  0xde   : > { %3969 = vmatprep.mubr.msk.bf16.mxu0 %vm661_vm3, %v5646_v33 }
  0xe4   : > { %3816 = vmatmul.mubr.msk.bf16.gmra.mrb[20].mxu1 %vm661_vm3, %v5071_v0  ;;  %3970 = vmatmul.mubr.msk.bf16.gmra.mrb[4].mxu0 %vm661_vm3, %v5647_v39 }
  0xe5   : > { %3819 = vmatprep.mubr.msk.bf16.mxu1 %vm661_vm3, %v5112_v62  ;;  %3973 = vmatprep.mubr.msk.bf16.mxu0 %vm661_vm3, %v5648_v58 }
  0xec   : > { %3820 = vmatmul.mubr.msk.bf16.gmra.mrb[24].mxu1 %vm661_vm3, %v5139_v31  ;;  %3974 = vmatmul.mubr.msk.bf16.gmra.mrb[8].mxu0 %vm661_vm3, %v5649_v42 }
  0xed   : > { %3823 = vmatprep.mubr.msk.bf16.mxu1 %vm661_vm3, %v5175_v44  ;;  %3977 = vmatprep.mubr.msk.bf16.mxu0 %vm661_vm3, %v5650_v15 }
  0xf4   : > { %3824 = vmatmul.mubr.msk.bf16.gmra.mrb[28].mxu1 %vm661_vm3, %v5185_v1  ;;  %3978 = vmatmul.mubr.msk.bf16.gmra.mrb[12].mxu0 %vm661_vm3, %v5651_v27 }
  0xf5   : > { %3829 = vmatprep.mubr.msk.bf16.mxu1 %vm661_vm3, %v4577_v38  ;;  %3981 = vmatprep.mubr.msk.bf16.mxu0 %vm661_vm3, %v5652_v6  ;;  %v2449_v38 = vshll.u32 %v5302_v9, 16 }
  0xf7   : > { %v2451_v18 = vrot.slane %v2449_v38, 5 }
  0xf9   : > { %v2456_v59 = vor.u32 %v2455_v43, %v2451_v18 }
  0xfb   : > { %v2457_v2 = vrot.slane %v2456_v59, 4 }
  0xfc   : > { %3830 = vmatmul.mubr.msk.bf16.vlgmr.msra.gmra.mrb[0].mxu1 %vm661_vm3, %v5066_v47  ;;  %3982 = vmatmul.mubr.msk.bf16.gmra.mrb[16].mxu0 %vm661_vm3, %v5653_v7  ;;  %v2442_v47 = vrot.slane %v2440_v60, 4 }
  0xfd   : > { %4032 = vmatpush3.bf16.msra.mxu1 %v5654_v25  ;;  %3833 = vmatprep.mubr.msk.bf16.mxu1 %vm661_vm3, %v5092_v23 }
  0xfe   : > { %3985 = vmatprep.mubr.msk.bf16.mxu0 %vm661_vm3, %v5655_v46  ;;  %v2446_v23 = vor.u32 %v2445_v32, %v2442_v47 }
 0x100   : > { %v2447_v48 = vrot.slane %v2446_v23, 4 }
 0x104   : > { %3834 = vmatmul.mubr.msk.bf16.gmra.mrb[4].mxu1 %vm661_vm3, %v5137_v56  ;;  %3986 = vmatmul.mubr.msk.bf16.gmra.mrb[20].mxu0 %vm661_vm3, %v5656_v12  ;;  %v2452_v56 = vsel %vm4571_vm4, %v2447_v48, %v2451_v18 }
 0x105   : > { %3837 = vmatprep.mubr.msk.bf16.mxu1 %vm661_vm3, %v5173_v53  ;;  %3989 = vmatprep.mubr.msk.bf16.mxu0 %vm661_vm3, %v5005_v30  ;;  %v2462_v53 = vsel %vm4571_vm4, %v2457_v2, %v2461_v61 }
 0x106   : > { %v3371_v17 = vcombine.low %v2452_v56, %v2462_v53 }
 0x10c   : > { %3838 = vmatmul.mubr.msk.bf16.gmra.mrb[8].mxu1 %vm661_vm3, %v5179_v8  ;;  %3990 = vmatmul.mubr.msk.bf16.gmra.mrb[24].mxu0 %vm661_vm3, %v5032_v63 }
 0x10d   : > { %3841 = vmatprep.mubr.msk.bf16.mxu1 %vm661_vm3, %v5202_v40  ;;  %3993 = vmatprep.mubr.msk.bf16.mxu0 %vm661_vm3, %v5210_v16 }
 0x114   : > { %3842 = vmatmul.mubr.msk.bf16.gmra.mrb[12].mxu1 %vm661_vm3, %v5098_v22  ;;  %3994 = vmatmul.mubr.msk.bf16.gmra.mrb[28].mxu0 %vm661_vm3, %v3371_v17 }
 0x115   : > { %3845 = vmatprep.mubr.msk.bf16.mxu1 %vm661_vm3, %v5108_v57  ;;  %3999 = vmatprep.mubr.msk.bf16.mxu0 %vm661_vm3, %v5639_v52 }
 0x11c   : > { %3846 = vmatmul.mubr.msk.bf16.gmra.mrb[16].mxu1 %vm661_vm3, %v5117_v5  ;;  %4000 = vmatmul.mubr.msk.bf16.vlgmr.msra.gmra.mrb[0].mxu0 %vm661_vm3, %v5640_v3 }
 0x11d   : > { %3849 = vmatprep.mubr.msk.bf16.mxu1 %vm661_vm3, %v5121_v49  ;;  %4003 = vmatprep.mubr.msk.bf16.mxu0 %vm661_vm3, %v5641_v4 }
 0x124   : > { %3850 = vmatmul.mubr.msk.bf16.gmra.mrb[20].mxu1 %vm661_vm3, %v5125_v54  ;;  %4004 = vmatmul.mubr.msk.bf16.gmra.mrb[4].mxu0 %vm661_vm3, %v5642_v21 }
 0x125   : > { %3853 = vmatprep.mubr.msk.bf16.mxu1 %vm661_vm3, %v5129_v36  ;;  %4007 = vmatprep.mubr.msk.bf16.mxu0 %vm661_vm3, %v5643_v13 }
 0x12c   : > { %3854 = vmatmul.mubr.msk.bf16.gmra.mrb[24].mxu1 %vm661_vm3, %v5133_v45  ;;  %4008 = vmatmul.mubr.msk.bf16.gmra.mrb[8].mxu0 %vm661_vm3, %v5003_v37  ;;  %v3388_v37 = vrot.slane %v5299_v24, 9 }
 0x12d   : > { %3857 = vmatprep.mubr.msk.bf16.mxu1 %vm661_vm3, %v5143_v29  ;;  %4011 = vmatprep.mubr.msk.bf16.mxu0 %vm661_vm3, %v5034_v41  ;;  %v2671_v41 = vrot.slane %v2669_v34, 4 }
 0x134   : > { %3858 = vmatmul.mubr.msk.bf16.gmra.mrb[28].mxu1 %vm661_vm3, %v5288_v11  ;;  %4012 = vmatmul.mubr.msk.bf16.gmra.mrb[12].mxu0 %vm661_vm3, %v5038_v50  ;;  %v2672_v50 = vrot.slane %v223_v55, 5 }
 0x135   : > { %3879 = vmatprep.mubr.msk.bf16.mxu1 %vm661_vm3, %v5651_v27  ;;  %4015 = vmatprep.mubr.msk.bf16.mxu0 %vm661_vm3, %v5060_v20  ;;  %v2670_v20 = vsel %vm4752_vm7, %v3388_v37, %v2669_v34 }
 0x13c   : > { %3880 = vmatmul.mubr.msk.bf16.vlgmr.msra.gmra.mrb[16].mxu1 %vm661_vm3, %v5652_v6  ;;  %4016 = vmatmul.mubr.msk.bf16.gmra.mrb[16].mxu0 %vm661_vm3, %v5071_v0  ;;  %v2673_v0 = vsel %vm4752_vm7, %v2671_v41, %v2672_v50 }
 0x13d   : > { %3883 = vmatprep.mubr.msk.bf16.mxu1 %vm661_vm3, %v5653_v7  ;;  %4019 = vmatprep.mubr.msk.bf16.mxu0 %vm661_vm3, %v5112_v62  ;;  %v3389_v22 = vcombine.low %v2670_v20, %v2673_v0 }
 0x144   : > { %3884 = vmatmul.mubr.msk.bf16.gmra.mrb[20].mxu1 %vm661_vm3, %v5655_v46  ;;  %4020 = vmatmul.mubr.msk.bf16.gmra.mrb[20].mxu0 %vm661_vm3, %v5139_v31 }
 0x145   : > { %3887 = vmatprep.mubr.msk.bf16.mxu1 %vm661_vm3, %v5656_v12  ;;  %4023 = vmatprep.mubr.msk.bf16.mxu0 %vm661_vm3, %v5175_v44 }
 0x14c   : > { %3888 = vmatmul.mubr.msk.bf16.gmra.mrb[24].mxu1 %vm661_vm3, %v5005_v30  ;;  %4024 = vmatmul.mubr.msk.bf16.gmra.mrb[24].mxu0 %vm661_vm3, %v5185_v1 }
 0x14d   : > { %3891 = vmatprep.mubr.msk.bf16.mxu1 %vm661_vm3, %v5032_v63  ;;  %4027 = vmatprep.mubr.msk.bf16.mxu0 %vm661_vm3, %v5204_v19 }
 0x154   : > { %3892 = vmatmul.mubr.msk.bf16.gmra.mrb[28].mxu1 %vm661_vm3, %v5210_v16  ;;  %4028 = vmatmul.mubr.msk.bf16.gmra.mrb[28].mxu0 %vm661_vm3, %v3389_v22  ;;  %v5463_v16 = vld [vmem:[%s5576_s2] ss:$0 sm:$0xff] }
 0x1cf   : > { %v3831_v30 = vpop.f32.mrb[0].mxu1 }
 0x1d0   : > { %v1637_v57 = vpop.f32.mrb[1].mxu1 }
 0x1d1   : > { %v3832_v62 = vpop.f32.mrb[2].mxu1 }
 0x1d2   : > { %v1640_v5 = vpop.f32.mrb[3].mxu1 }
 0x1d7   : > { %v3835_v63 = vpop.f32.mrb[4].mxu1 }
 0x1d8   : > { %v1653_v49 = vpop.f32.mrb[5].mxu1 }
 0x1d9   : > { %v3836_v54 = vpop.f32.mrb[6].mxu1 }
 0x1da   : > { %v1656_v36 = vpop.f32.mrb[7].mxu1 }
 0x1df   : > { %v3839_v45 = vpop.f32.mrb[8].mxu1 }
 0x1e0   : > { %v1669_v31 = vpop.f32.mrb[9].mxu1 }
 0x1e1   : > { %v3840_v29 = vpop.f32.mrb[10].mxu1 }
 0x1e2   : > { %v1672_v26 = vpop.f32.mrb[11].mxu1 }
 0x1e7   : > { %v5452_v44 = vpop.f32.mrb[12].mxu1 }
 0x1e8   : > { %v5454_v8 = vpop.f32.mrb[13].mxu1 }
 0x1e9   : > { %v5456_v1 = vpop.f32.mrb[14].mxu1 }
 0x1ea   : > { %v5458_v40 = vpop.f32.mrb[15].mxu1 }
 0x1ef   : > { %v4001_v19 = vpop.f32.mrb[0].mxu0 }
 0x1f0   : > { %v4033_v52 = vadd.f32 %v4001_v19, %v3831_v30  ;;  %v2718_v3 = vpop.f32.mrb[1].mxu0 }
 0x1f1   : > { %v4034_v4 = vadd.f32 %v2718_v3, %v1637_v57  ;;  %v4002_v11 = vpop.f32.mrb[2].mxu0 }
 0x1f2   : > { %v2886_v21 = vadd.f32 %v4033_v52, %v5463_v16  ;;  %v4035_v13 = vadd.f32 %v4002_v11, %v3832_v62  ;;  %v2721_v24 = vpop.f32.mrb[3].mxu0 }
 0x1f3   : > { %v2884_v9 = vadd.f32 %v4034_v4, %v5463_v16  ;;  %v4036_v10 = vadd.f32 %v2721_v24, %v1640_v5 }
 0x1f4   : > { %v2887_v51 = vadd.f32 %v4035_v13, %v5463_v16  ;;  %v2918_v39 = vmax.f32 %v2886_v21, 0.0 }
 0x1f5   : > { %v2885_v33 = vadd.f32 %v4036_v10, %v5463_v16  ;;  %v2916_v42 = vmax.f32 %v2884_v9, 0.0 }
 0x1f6   : > { %v2919_v58 = vmax.f32 %v2887_v51, 0.0 }
 0x1f7   : > { %v2917_v15 = vmax.f32 %v2885_v33, 0.0  ;;  %v4005_v27 = vpop.f32.mrb[4].mxu0 }
 0x1f8   : > { %v3485_v6 = vpack.c.bf16 %v2919_v58, %v2918_v39  ;;  %v4037_v7 = vadd.f32 %v4005_v27, %v3835_v63  ;;  %v2734_v60 = vpop.f32.mrb[5].mxu0 }
 0x1f9   : > { %v3480_v14 = vpack.c.bf16 %v2917_v15, %v2916_v42  ;;  %v4038_v28 = vadd.f32 %v2734_v60, %v1653_v49  ;;  %v4006_v25 = vpop.f32.mrb[6].mxu0 }
 0x1fa   : > { %3557 = vst [vmem:[%s5472_s8 + $0x8] sm:$0xff] %v3485_v6   ;;  %v2890_v38 = vadd.f32 %v4037_v7, %v5463_v16  ;;  %v4039_v46 = vadd.f32 %v4006_v25, %v3836_v54  ;;  %v2737_v47 = vpop.f32.mrb[7].mxu0 }
 0x1fb   : > { %3481 = vst [vmem:[%s5472_s8] sm:$0xff] %v3480_v14   ;;  %v2888_v32 = vadd.f32 %v4038_v28, %v5463_v16  ;;  %v4040_v18 = vadd.f32 %v2737_v47, %v1656_v36 }
 0x1fc   : > { %v2891_v43 = vadd.f32 %v4039_v46, %v5463_v16  ;;  %v2922_v12 = vmax.f32 %v2890_v38, 0.0 }
 0x1fd   : > { %v2889_v55 = vadd.f32 %v4040_v18, %v5463_v16  ;;  %v2920_v59 = vmax.f32 %v2888_v32, 0.0 }
 0x1fe   : > { %v2923_v23 = vmax.f32 %v2891_v43, 0.0 }
 0x1ff   : > { %v2921_v35 = vmax.f32 %v2889_v55, 0.0  ;;  %v4009_v48 = vpop.f32.mrb[8].mxu0 }
 0x200   : > { %v3495_v2 = vpack.c.bf16 %v2923_v23, %v2922_v12  ;;  %v4041_v61 = vadd.f32 %v4009_v48, %v3839_v45  ;;  %v2750_v56 = vpop.f32.mrb[9].mxu0 }
 0x201   : > { %v3490_v53 = vpack.c.bf16 %v2921_v35, %v2920_v59  ;;  %v4042_v17 = vadd.f32 %v2750_v56, %v1669_v31  ;;  %v4010_v34 = vpop.f32.mrb[10].mxu0 }
 0x202   : > { %3559 = vst [vmem:[%s5472_s8 + $0x18] sm:$0xff] %v3495_v2   ;;  %v2894_v37 = vadd.f32 %v4041_v61, %v5463_v16  ;;  %v4043_v41 = vadd.f32 %v4010_v34, %v3840_v29  ;;  %v2753_v50 = vpop.f32.mrb[11].mxu0 }
 0x203   : > { %3558 = vst [vmem:[%s5472_s8 + $0x10] sm:$0xff] %v3490_v53   ;;  %v2892_v20 = vadd.f32 %v4042_v17, %v5463_v16  ;;  %v4044_v0 = vadd.f32 %v2753_v50, %v1672_v26 }
 0x204   : > { %v2895_v22 = vadd.f32 %v4043_v41, %v5463_v16  ;;  %v2926_v57 = vmax.f32 %v2894_v37, 0.0 }
 0x205   : > { %v2893_v30 = vadd.f32 %v4044_v0, %v5463_v16  ;;  %v2924_v5 = vmax.f32 %v2892_v20, 0.0 }
 0x206   : > { %v2927_v62 = vmax.f32 %v2895_v22, 0.0 }
 0x207   : > { %v2925_v63 = vmax.f32 %v2893_v30, 0.0  ;;  %v4013_v49 = vpop.f32.mrb[12].mxu0 }
 0x208   : > { %v3505_v54 = vpack.c.bf16 %v2927_v62, %v2926_v57  ;;  %v4045_v36 = vadd.f32 %v4013_v49, %v5452_v44  ;;  %v2766_v45 = vpop.f32.mrb[13].mxu0 }
 0x209   : > { %v3500_v31 = vpack.c.bf16 %v2925_v63, %v2924_v5  ;;  %v4046_v29 = vadd.f32 %v2766_v45, %v5454_v8  ;;  %v4014_v19 = vpop.f32.mrb[14].mxu0 }
 0x20a   : > { %3561 = vst [vmem:[%s5472_s8 + $0x28] sm:$0xff] %v3505_v54   ;;  %v2898_v26 = vadd.f32 %v4045_v36, %v5463_v16  ;;  %v4047_v52 = vadd.f32 %v4014_v19, %v5456_v1  ;;  %v2769_v3 = vpop.f32.mrb[15].mxu0 }
 0x20b   : > { %3560 = vst [vmem:[%s5472_s8 + $0x20] sm:$0xff] %v3500_v31   ;;  %v2896_v4 = vadd.f32 %v4046_v29, %v5463_v16  ;;  %v4048_v11 = vadd.f32 %v2769_v3, %v5458_v40 }
 0x20c   : > { %v2899_v21 = vadd.f32 %v4047_v52, %v5463_v16  ;;  %v2930_v13 = vmax.f32 %v2898_v26, 0.0 }
 0x20d   : > { %v2897_v44 = vadd.f32 %v4048_v11, %v5463_v16  ;;  %v2928_v8 = vmax.f32 %v2896_v4, 0.0 }
 0x20e   : > { %v2931_v24 = vmax.f32 %v2899_v21, 0.0 }
 0x20f   : > { %v2929_v9 = vmax.f32 %v2897_v44, 0.0  ;;  %v3881_v10 = vpop.f32.mrb[16].mxu1  ;;  %v4017_v51 = vpop.f32.mrb[16].mxu0 }
 0x210   : > { %v3515_v33 = vpack.c.bf16 %v2931_v24, %v2930_v13  ;;  %v4049_v1 = vadd.f32 %v4017_v51, %v3881_v10  ;;  %v1928_v39 = vpop.f32.mrb[17].mxu1  ;;  %v2782_v58 = vpop.f32.mrb[17].mxu0 }
 0x211   : > { %v3510_v42 = vpack.c.bf16 %v2929_v9, %v2928_v8  ;;  %v4050_v15 = vadd.f32 %v2782_v58, %v1928_v39  ;;  %v3882_v27 = vpop.f32.mrb[18].mxu1  ;;  %v4018_v40 = vpop.f32.mrb[18].mxu0 }
 0x212   : > { %3563 = vst [vmem:[%s5472_s8 + $0x38] sm:$0xff] %v3515_v33   ;;  %v2902_v6 = vadd.f32 %v4049_v1, %v5463_v16  ;;  %v4051_v7 = vadd.f32 %v4018_v40, %v3882_v27  ;;  %v1931_v60 = vpop.f32.mrb[19].mxu1  ;;  %v2785_v14 = vpop.f32.mrb[19].mxu0 }
 0x213   : > { %3562 = vst [vmem:[%s5472_s8 + $0x30] sm:$0xff] %v3510_v42   ;;  %v2900_v28 = vadd.f32 %v4050_v15, %v5463_v16  ;;  %v4052_v25 = vadd.f32 %v2785_v14, %v1931_v60 }
 0x214   : > { %v2903_v38 = vadd.f32 %v4051_v7, %v5463_v16  ;;  %v2934_v47 = vmax.f32 %v2902_v6, 0.0 }
 0x215   : > { %v2901_v46 = vadd.f32 %v4052_v25, %v5463_v16  ;;  %v2932_v18 = vmax.f32 %v2900_v28, 0.0 }
 0x216   : > { %v2935_v32 = vmax.f32 %v2903_v38, 0.0 }
 0x217   : > { %v2933_v43 = vmax.f32 %v2901_v46, 0.0  ;;  %v3885_v55 = vpop.f32.mrb[20].mxu1  ;;  %v4021_v12 = vpop.f32.mrb[20].mxu0 }
 0x218   : > { %v3525_v23 = vpack.c.bf16 %v2935_v32, %v2934_v47  ;;  %v4053_v59 = vadd.f32 %v4021_v12, %v3885_v55  ;;  %v1944_v35 = vpop.f32.mrb[21].mxu1  ;;  %v2798_v48 = vpop.f32.mrb[21].mxu0 }
 0x219   : > { %v3520_v2 = vpack.c.bf16 %v2933_v43, %v2932_v18  ;;  %v4054_v61 = vadd.f32 %v2798_v48, %v1944_v35  ;;  %v3886_v56 = vpop.f32.mrb[22].mxu1  ;;  %v4022_v53 = vpop.f32.mrb[22].mxu0 }
 0x21a   : > { %3565 = vst [vmem:[%s5472_s8 + $0x48] sm:$0xff] %v3525_v23   ;;  %v2906_v17 = vadd.f32 %v4053_v59, %v5463_v16  ;;  %v4055_v34 = vadd.f32 %v4022_v53, %v3886_v56  ;;  %v1947_v37 = vpop.f32.mrb[23].mxu1  ;;  %v2801_v41 = vpop.f32.mrb[23].mxu0 }
 0x21b   : > { %3564 = vst [vmem:[%s5472_s8 + $0x40] sm:$0xff] %v3520_v2   ;;  %v2904_v50 = vadd.f32 %v4054_v61, %v5463_v16  ;;  %v4056_v20 = vadd.f32 %v2801_v41, %v1947_v37 }
 0x21c   : > { %v2907_v0 = vadd.f32 %v4055_v34, %v5463_v16  ;;  %v2938_v30 = vmax.f32 %v2906_v17, 0.0 }
 0x21d   : > { %v2905_v22 = vadd.f32 %v4056_v20, %v5463_v16  ;;  %v2936_v62 = vmax.f32 %v2904_v50, 0.0 }
 0x21e   : > { %v2939_v57 = vmax.f32 %v2907_v0, 0.0 }
 0x21f   : > { %v2937_v5 = vmax.f32 %v2905_v22, 0.0  ;;  %v3889_v63 = vpop.f32.mrb[24].mxu1  ;;  %v4025_v49 = vpop.f32.mrb[24].mxu0 }
 0x220   : > { %v3535_v54 = vpack.c.bf16 %v2939_v57, %v2938_v30  ;;  %v4057_v36 = vadd.f32 %v4025_v49, %v3889_v63  ;;  %v1960_v45 = vpop.f32.mrb[25].mxu1  ;;  %v2814_v31 = vpop.f32.mrb[25].mxu0 }
 0x221   : > { %v3530_v29 = vpack.c.bf16 %v2937_v5, %v2936_v62  ;;  %v4058_v19 = vadd.f32 %v2814_v31, %v1960_v45  ;;  %v3890_v26 = vpop.f32.mrb[26].mxu1  ;;  %v4026_v52 = vpop.f32.mrb[26].mxu0 }
 0x222   : > { %3567 = vst [vmem:[%s5472_s8 + $0x58] sm:$0xff] %v3535_v54   ;;  %v2910_v3 = vadd.f32 %v4057_v36, %v5463_v16  ;;  %v4059_v4 = vadd.f32 %v4026_v52, %v3890_v26  ;;  %v1963_v11 = vpop.f32.mrb[27].mxu1  ;;  %v2817_v21 = vpop.f32.mrb[27].mxu0 }
 0x223   : > { %3566 = vst [vmem:[%s5472_s8 + $0x50] sm:$0xff] %v3530_v29   ;;  %v2908_v44 = vadd.f32 %v4058_v19, %v5463_v16  ;;  %v4060_v13 = vadd.f32 %v2817_v21, %v1963_v11 }
 0x224   : > { %v2911_v24 = vadd.f32 %v4059_v4, %v5463_v16  ;;  %v2942_v9 = vmax.f32 %v2910_v3, 0.0 }
 0x225   : > { %v2909_v8 = vadd.f32 %v4060_v13, %v5463_v16  ;;  %v2940_v51 = vmax.f32 %v2908_v44, 0.0 }
 0x226   : > { %v2943_v10 = vmax.f32 %v2911_v24, 0.0 }
 0x227   : > { %v2941_v33 = vmax.f32 %v2909_v8, 0.0  ;;  %v3893_v1 = vpop.f32.mrb[28].mxu1  ;;  %v4029_v39 = vpop.f32.mrb[28].mxu0 }
 0x228   : > { %v3545_v58 = vpack.c.bf16 %v2943_v10, %v2942_v9  ;;  %v4061_v42 = vadd.f32 %v4029_v39, %v3893_v1  ;;  %v1976_v15 = vpop.f32.mrb[29].mxu1  ;;  %v2830_v27 = vpop.f32.mrb[29].mxu0 }
 0x229   : > { %v3540_v40 = vpack.c.bf16 %v2941_v33, %v2940_v51  ;;  %v4062_v6 = vadd.f32 %v2830_v27, %v1976_v15  ;;  %v3894_v7 = vpop.f32.mrb[30].mxu1  ;;  %v4030_v60 = vpop.f32.mrb[30].mxu0 }
 0x22a   : > { %3569 = vst [vmem:[%s5472_s8 + $0x68] sm:$0xff] %v3545_v58   ;;  %v2914_v14 = vadd.f32 %v4061_v42, %v5463_v16  ;;  %v4063_v28 = vadd.f32 %v4030_v60, %v3894_v7  ;;  %v1979_v25 = vpop.f32.mrb[31].mxu1  ;;  %v2833_v38 = vpop.f32.mrb[31].mxu0 }
 0x22b   : > { %3568 = vst [vmem:[%s5472_s8 + $0x60] sm:$0xff] %v3540_v40   ;;  %v2912_v46 = vadd.f32 %v4062_v6, %v5463_v16  ;;  %v4064_v47 = vadd.f32 %v2833_v38, %v1979_v25 }
 0x22c   : > { %v2915_v32 = vadd.f32 %v4063_v28, %v5463_v16  ;;  %v2946_v43 = vmax.f32 %v2914_v14, 0.0 }
 0x22d   : > { %v2913_v18 = vadd.f32 %v4064_v47, %v5463_v16  ;;  %v2944_v12 = vmax.f32 %v2912_v46, 0.0 }
 0x22e   : > { %v2947_v55 = vmax.f32 %v2915_v32, 0.0 }
 0x22f   : > { %v2945_v23 = vmax.f32 %v2913_v18, 0.0 }
 0x230   : > { %v3555_v59 = vpack.c.bf16 %v2947_v55, %v2946_v43 }
 0x231   : > { %v3550_v35 = vpack.c.bf16 %v2945_v23, %v2944_v12 }
 0x232   : > { %3571 = vst [vmem:[%s5472_s8 + $0x78] sm:$0xff] %v3555_v59  }
 0x233   : > { %3570 = vst [vmem:[%s5472_s8 + $0x70] sm:$0xff] %v3550_v35  }
 0x234   : > { %4376 = shalt.err (!%p4373_p3)
}
 0x235   : > { %s4377_s27 = scalar_lea.hbm %s5525_s19, 2048  ;;  %s4381_s30 = scalar_lea.hbm %s5577_s3, 16384 }
 0x236   : > { %p4378_p4 = scmp.ne.s32.totalorder %s5525_s19, %s4377_s27  ;;  %p4382_p9 = scmp.lt.u32.totalorder %s5525_s19, %s5577_s3 }
 0x237   : > { %p4383_p10 = scmp.lt.u32.totalorder %s4381_s30, %s4377_s27  ;;  %p4385_p12 = scmp.lt.u32.totalorder %s4377_s27, %s5525_s19 }
 0x238   : > { %p4379_p7 = pnand %p4378_p4, %p4488_p5 }
 0x239   : > { %p4384_p11 = por %p4383_p10, %p4382_p9 }
 0x23a   : > { %p4380_p8 = pneg %p4379_p7 }
 0x23b   : > { %p4386_p13 = por %p4385_p12, %p4384_p11 }
 0x23d   : > { %p4387_p0 = pnand %p4386_p13, %p4380_p8 }
 0x23f   : > { %4390 = shalt.err (!%p4387_p0)
}
 0x240   : > { %s4428_s6 = smov 64   ;;  %s4429_s7 = smov 4  }
 0x241   : > { %4300 = dma.vmem_to_hbm [thread:$0]  (%p4488_p5), %s5527_s10, 2048, %s5525_s19, %s5533_s16, %s4428_s6, %s4428_s6, %s4429_s7  }
 0x242 PF: > { %p4306_p1 = scmp.ge.s32.totalorder %s4425_s15, 2  ;;  %s3137_s8 = sand.u32 1, %s4413_s12  }
 0x243   : > { %s3138_s9 = scalar_lea.sflag [#allocation3], %s3137_s8 }
 0x244   : > { %p4303_p2 = pnand %p4306_p1, %p4492_p6 }
 0x246   : > { %4408 = dma.done.wait (!%p4303_p2), %s3138_s9, 2048  }
 0x247   : > { %4410 = vsyncadd (!%p4303_p2), %s3138_s9, 4294965248  ;;  %p13_p3 = scmp.ge.s32.totalorder %s4475_s18, 10   ;;  %s5657_s12 = smov %s4417_s13 }
 0x248   : > { %s5658_s13 = smov %s4421_s14  ;;  %s5659_s14 = smov %s4486_s21 }
 0x249   : > { %s5660_s15 = smov %s4475_s18  ;;  %15 = sbr.rel (!%p13_p3) target bundleno = 3 (0x3), region = 67 }
 0x250   :  { %3143 = vsyncpa [#allocation3], 1 }
 0x251   :  { %3145 = vsyncpa [#allocation3 + $0x1], 1 }

</bundles_post_ra>
